<compile_context>
chip_gen: v5e
topology: v5e:2x2
jax: 0.10.0
libtpu: 0.0.40
codegen_flags: <defaults>
</compile_context>

<pallas_src>
import functools
import math

import jax
import jax.numpy as jnp
from jax.experimental import pallas as pl
from jax.experimental.pallas import tpu as pltpu

COMPUTE_DTYPE = jnp.bfloat16            # matmul operand / activation-slab dtype
_VMEM_LIMIT = 48 * 1024 * 1024          # fits v7x (64 MiB/TC), below v5e/v6e 128 MiB


# ---------------------------------------------------------------------------
# helpers
# ---------------------------------------------------------------------------

def _round_up(x, m):
    return (x + m - 1) // m * m


def _pick_row_tile(m):
    # Prefer >= 2 grid steps so the "parallel" row axis can shard across the two
    # TensorCores of a v7x chip, with 8-aligned sublane tiles.
    for t in (256, 128, 64, 32, 16, 8):
        if m % t == 0 and m >= 2 * t:
            return t
    return m if m % 8 else 8


def _cparams(dims):
    return pltpu.CompilerParams(dimension_semantics=dims,
                                vmem_limit_bytes=_VMEM_LIMIT)


def _cost(m, k, n, transcendentals=0):
    # bf16 operands, f32 output path — advisory only.
    return pl.CostEstimate(flops=2 * m * k * n,
                           transcendentals=int(transcendentals),
                           bytes_accessed=2 * (m * k + k * n + m * n))


# ---------------------------------------------------------------------------
# Pallas kernels
# ---------------------------------------------------------------------------

def _matmul_bias_kernel(x_ref, w_ref, bias_ref, o_ref, acc_ref):
    # grid = (M_tiles, K_tiles); output block is K-resident (accumulator).
    @pl.when(pl.program_id(1) == 0)
    def _():
        acc_ref[...] = jnp.zeros_like(acc_ref)

    acc_ref[...] += jnp.dot(x_ref[...], w_ref[...],
                            preferred_element_type=jnp.float32)

    @pl.when(pl.program_id(1) == pl.num_programs(1) - 1)
    def _():
        # bias added exactly once, at finalize.
        o_ref[...] = (acc_ref[...] + bias_ref[...].astype(jnp.float32)).astype(o_ref.dtype)


def _ln_linear_kernel(x_ref, g_ref, b_ref, w_ref, bias_ref, o_ref, *, eps, activation):
    # out = act(LayerNorm(x) @ w + bias);  LN math in f32, matmul operands bf16.
    x = x_ref[...].astype(jnp.float32)                       # (tm, D)
    mean = jnp.mean(x, axis=-1, keepdims=True)
    var = jnp.mean((x - mean) * (x - mean), axis=-1, keepdims=True)
    xhat = (x - mean) * jax.lax.rsqrt(var + eps)
    y = xhat * g_ref[...].astype(jnp.float32) + b_ref[...].astype(jnp.float32)
    z = jnp.dot(y.astype(w_ref.dtype), w_ref[...],
                preferred_element_type=jnp.float32) + bias_ref[...].astype(jnp.float32)
    if activation == "gelu":
        # exact (erf) GELU, matching torch.nn.GELU() default
        z = 0.5 * z * (1.0 + jax.lax.erf(z * (1.0 / math.sqrt(2.0))))
    o_ref[...] = z.astype(o_ref.dtype)


def _linear_residual_kernel(x_ref, w_ref, bias_ref, res_ref, o_ref):
    # out = residual + x @ w + bias  (projection / MLP2 fused with residual add)
    z = jnp.dot(x_ref[...], w_ref[...], preferred_element_type=jnp.float32)
    z = z + bias_ref[...].astype(jnp.float32) + res_ref[...].astype(jnp.float32)
    o_ref[...] = z.astype(o_ref.dtype)


def _layernorm_kernel(x_ref, g_ref, b_ref, o_ref, *, eps):
    x = x_ref[...].astype(jnp.float32)
    mean = jnp.mean(x, axis=-1, keepdims=True)
    var = jnp.mean((x - mean) * (x - mean), axis=-1, keepdims=True)
    xhat = (x - mean) * jax.lax.rsqrt(var + eps)
    o_ref[...] = (xhat * g_ref[...].astype(jnp.float32)
                  + b_ref[...].astype(jnp.float32)).astype(o_ref.dtype)


def _attn_kernel(qkv_ref, *out_refs, heads, head_dim, need_weights):
    # One image per grid step; all heads of that image handled here (static unroll).
    # q/k/v and the per-head split are column slices of the fused (S, 3D) block —
    # no HBM reshape/transpose between kernels.
    o_ref = out_refs[0]
    S = qkv_ref.shape[1]
    D = heads * head_dim
    qkv = qkv_ref[0]                                          # (S, 3D) bf16
    scale = 1.0 / math.sqrt(head_dim)

    outs = []
    w_sum = jnp.zeros((S, S), jnp.float32)
    for h in range(heads):
        lo = h * head_dim
        q = qkv[:, lo:lo + head_dim]                          # (S, dh)
        k = qkv[:, D + lo:D + lo + head_dim]                  # (S, dh)
        v = qkv[:, 2 * D + lo:2 * D + lo + head_dim]          # (S, dh)
        # scores = q @ k^T without materializing a transpose (contract last dims)
        s = jax.lax.dot_general(q, k, (((1,), (1,)), ((), ())),
                                preferred_element_type=jnp.float32) * scale
        s = s - jnp.max(s, axis=-1, keepdims=True)
        p = jnp.exp(s)
        p = p * pl.reciprocal(jnp.sum(p, axis=-1, keepdims=True), approx=True)
        w_sum = w_sum + p
        outs.append(jax.lax.dot_general(p.astype(v.dtype), v,
                                        (((1,), (0,)), ((), ())),
                                        preferred_element_type=jnp.float32))
    o_ref[0] = jnp.concatenate(outs, axis=-1).astype(o_ref.dtype)     # (S, D)
    if need_weights:
        # torch MultiheadAttention average_attn_weights=True: mean over heads.
        out_refs[1][0] = (w_sum * (1.0 / heads)).astype(out_refs[1].dtype)


# ---------------------------------------------------------------------------
# Pallas wrappers
# ---------------------------------------------------------------------------

def matmul_bias_pallas(x, w, b, *, tk_target=512):
    """out = x @ w + b; grid (M_tiles, K_tiles), f32 VMEM accumulator."""
    M, K = x.shape
    Kw, N = w.shape
    assert K == Kw
    tm = _pick_row_tile(M)
    tk = tk_target if (K % tk_target == 0 and K > tk_target) else K
    return pl.pallas_call(
        _matmul_bias_kernel,
        grid=(M // tm, K // tk),
        in_specs=[
            pl.BlockSpec((tm, tk), lambda i, k: (i, k)),
            pl.BlockSpec((tk, N), lambda i, k: (k, 0)),
            pl.BlockSpec((1, N), lambda i, k: (0, 0)),
        ],
        out_specs=pl.BlockSpec((tm, N), lambda i, k: (i, 0)),
        out_shape=jax.ShapeDtypeStruct((M, N), COMPUTE_DTYPE),
        scratch_shapes=[pltpu.VMEM((tm, N), jnp.float32)],
        compiler_params=_cparams(("parallel", "arbitrary")),
        cost_estimate=_cost(M, K, N),
    )(x, w, b.reshape(1, N))


def ln_linear_pallas(x, gamma, beta, w, bias, activation=None, eps=1e-6):
    """out = act(LayerNorm(x) @ w + bias), row-tiled, LN fused into the linear."""
    M, D = x.shape
    Dw, N = w.shape
    assert D == Dw
    tm = _pick_row_tile(M)
    kern = functools.partial(_ln_linear_kernel, eps=eps, activation=activation)
    return pl.pallas_call(
        kern,
        grid=(M // tm,),
        in_specs=[
            pl.BlockSpec((tm, D), lambda i: (i, 0)),
            pl.BlockSpec((1, D), lambda i: (0, 0)),
            pl.BlockSpec((1, D), lambda i: (0, 0)),
            pl.BlockSpec((D, N), lambda i: (0, 0)),
            pl.BlockSpec((1, N), lambda i: (0, 0)),
        ],
        out_specs=pl.BlockSpec((tm, N), lambda i: (i, 0)),
        out_shape=jax.ShapeDtypeStruct((M, N), COMPUTE_DTYPE),
        compiler_params=_cparams(("parallel",)),
        cost_estimate=_cost(M, D, N,
                            transcendentals=M * N if activation == "gelu" else 0),
    )(x, gamma.reshape(1, D), beta.reshape(1, D), w, bias.reshape(1, N))


def linear_residual_pallas(x, w, bias, residual):
    """out = residual + x @ w + bias, row-tiled (fused residual add)."""
    M, K = x.shape
    Kw, N = w.shape
    assert K == Kw
    tm = _pick_row_tile(M)
    return pl.pallas_call(
        _linear_residual_kernel,
        grid=(M // tm,),
        in_specs=[
            pl.BlockSpec((tm, K), lambda i: (i, 0)),
            pl.BlockSpec((K, N), lambda i: (0, 0)),
            pl.BlockSpec((1, N), lambda i: (0, 0)),
            pl.BlockSpec((tm, N), lambda i: (i, 0)),
        ],
        out_specs=pl.BlockSpec((tm, N), lambda i: (i, 0)),
        out_shape=jax.ShapeDtypeStruct((M, N), COMPUTE_DTYPE),
        compiler_params=_cparams(("parallel",)),
        cost_estimate=_cost(M, K, N),
    )(x, w, bias.reshape(1, N), residual)


def layernorm_pallas(x, gamma, beta, eps=1e-6, out_dtype=None):
    M, D = x.shape
    tm = _pick_row_tile(M)
    kern = functools.partial(_layernorm_kernel, eps=eps)
    return pl.pallas_call(
        kern,
        grid=(M // tm,),
        in_specs=[
            pl.BlockSpec((tm, D), lambda i: (i, 0)),
            pl.BlockSpec((1, D), lambda i: (0, 0)),
            pl.BlockSpec((1, D), lambda i: (0, 0)),
        ],
        out_specs=pl.BlockSpec((tm, D), lambda i: (i, 0)),
        out_shape=jax.ShapeDtypeStruct((M, D), out_dtype or x.dtype),
        compiler_params=_cparams(("parallel",)),
    )(x, gamma.reshape(1, D), beta.reshape(1, D))


def attention_pallas(qkv, heads, need_weights=False):
    """Self-attention from the fused (B, S, 3D) QKV slab; one image per program."""
    B, S, threeD = qkv.shape
    D = threeD // 3
    dh = D // heads
    kern = functools.partial(_attn_kernel, heads=heads, head_dim=dh,
                             need_weights=need_weights)
    out_shape = [jax.ShapeDtypeStruct((B, S, D), COMPUTE_DTYPE)]
    out_specs = [pl.BlockSpec((1, S, D), lambda b: (b, 0, 0))]
    if need_weights:
        out_shape.append(jax.ShapeDtypeStruct((B, S, S), jnp.float32))
        out_specs.append(pl.BlockSpec((1, S, S), lambda b: (b, 0, 0)))
    res = pl.pallas_call(
        kern,
        grid=(B,),
        in_specs=[pl.BlockSpec((1, S, threeD), lambda b: (b, 0, 0))],
        out_specs=out_specs,
        out_shape=out_shape,
        compiler_params=_cparams(("parallel",)),
    )(qkv)
    if need_weights:
        return res[0], res[1]
    return res[0], None


# ---------------------------------------------------------------------------
# Model: parameters + forward
# ---------------------------------------------------------------------------

IMG = 64
PATCH = 32
CHANS = 3
HIDDEN = 32
HEADS = 4
MLP = 64
LAYERS = 2
SEQ = (IMG // PATCH) * (IMG // PATCH) + 1  # patches + cls token


def init_params(key):
    def nrm(key, shape, scale=0.02):
        return scale * jax.random.normal(key, shape, dtype=jnp.float32)

    keys = iter(jax.random.split(key, 64))
    p = {
        "conv_w": nrm(next(keys), (HIDDEN, CHANS, PATCH, PATCH)),
        "conv_b": nrm(next(keys), (HIDDEN,)),
        "cls": nrm(next(keys), (1, 1, HIDDEN)),
        "pos": nrm(next(keys), (1, SEQ, HIDDEN)),
        "ln_f_g": jnp.ones((HIDDEN,), jnp.float32),
        "ln_f_b": jnp.zeros((HIDDEN,), jnp.float32),
        "layers": [],
    }
    for _ in range(LAYERS):
        p["layers"].append({
            "ln1_g": jnp.ones((HIDDEN,), jnp.float32),
            "ln1_b": jnp.zeros((HIDDEN,), jnp.float32),
            "qkv_w": nrm(next(keys), (HIDDEN, 3 * HIDDEN)),   # = in_proj_weight.T
            "qkv_b": nrm(next(keys), (3 * HIDDEN,)),
            "out_w": nrm(next(keys), (HIDDEN, HIDDEN)),       # = out_proj.weight.T
            "out_b": nrm(next(keys), (HIDDEN,)),
            "ln2_g": jnp.ones((HIDDEN,), jnp.float32),
            "ln2_b": jnp.zeros((HIDDEN,), jnp.float32),
            "mlp_w1": nrm(next(keys), (HIDDEN, MLP)),
            "mlp_b1": nrm(next(keys), (MLP,)),
            "mlp_w2": nrm(next(keys), (MLP, HIDDEN)),
            "mlp_b2": nrm(next(keys), (HIDDEN,)),
        })
    return p


def patchify(x):
    # NCHW -> (B, num_patches, C*P*P); patch vector ordered (C, ph, pw),
    # matching the Conv2d weight layout (D, C, P, P).
    B, C, H, W = x.shape
    hp, wp = H // PATCH, W // PATCH
    x = x.reshape(B, C, hp, PATCH, wp, PATCH)
    x = x.transpose(0, 2, 4, 1, 3, 5)
    return x.reshape(B, hp * wp, C * PATCH * PATCH)


def vit_forward(x, params):
    B = x.shape[0]

    # --- patch embedding: Conv2d(k=32, s=32) == tiled matmul over flattened patches.
    patches = patchify(x).astype(COMPUTE_DTYPE)                      # (B, NP, C*P*P)
    NP = patches.shape[1]
    w_patch = params["conv_w"].reshape(HIDDEN, -1).T.astype(COMPUTE_DTYPE)
    emb = matmul_bias_pallas(patches.reshape(B * NP, -1), w_patch, params["conv_b"])
    emb = emb.astype(jnp.float32).reshape(B, NP, HIDDEN)

    # --- class token + positional embedding (cheap glue).
    cls = jnp.broadcast_to(params["cls"], (B, 1, HIDDEN))
    tok = jnp.concatenate([cls, emb], axis=1) + params["pos"]        # (B, S, D) f32
    # TODO(synk): dropout layers are eval-mode no-ops and are omitted.

    # Token slab padded to an 8-row multiple so the row-tiled kernels get aligned
    # tiles and a multi-step "parallel" grid axis; pad rows are never read back.
    Mtok = B * SEQ
    Mp = _round_up(Mtok, 8)
    h = tok.reshape(Mtok, HIDDEN).astype(COMPUTE_DTYPE)
    if Mp != Mtok:
        h = jnp.pad(h, ((0, Mp - Mtok), (0, 0)))

    attn_weights = None
    for li, lp in enumerate(params["layers"]):
        is_last = li == len(params["layers"]) - 1

        # -- self-attention block: LN1+QKV fused; heads split/merged inside the
        #    attention kernel; out-projection fused with the residual add.
        qkv = ln_linear_pallas(h, lp["ln1_g"], lp["ln1_b"],
                               lp["qkv_w"].astype(COMPUTE_DTYPE), lp["qkv_b"])
        qkv3 = qkv[:Mtok].reshape(B, SEQ, 3 * HIDDEN)
        o, w = attention_pallas(qkv3, HEADS, need_weights=is_last)
        if is_last:
            attn_weights = w                 # last-layer head-averaged weights (as before)
        o2d = o.reshape(Mtok, HIDDEN)
        if Mp != Mtok:
            o2d = jnp.pad(o2d, ((0, Mp - Mtok), (0, 0)))
        h = linear_residual_pallas(o2d, lp["out_w"].astype(COMPUTE_DTYPE),
                                   lp["out_b"], h)

        # -- MLP block: LN2 + MLP1 + GELU fused; MLP2 fused with the residual add.
        y = ln_linear_pallas(h, lp["ln2_g"], lp["ln2_b"],
                             lp["mlp_w1"].astype(COMPUTE_DTYPE), lp["mlp_b1"],
                             activation="gelu")
        h = linear_residual_pallas(y, lp["mlp_w2"].astype(COMPUTE_DTYPE),
                                   lp["mlp_b2"], h)

    # --- final LayerNorm; take the class token (heads == nn.Sequential() -> identity).
    hf = layernorm_pallas(h, params["ln_f_g"], params["ln_f_b"], out_dtype=jnp.float32)
    out = hf[:Mtok].reshape(B, SEQ, HIDDEN)[:, 0]                    # (B, D) f32
    return out, attn_weights


if __name__ == "__main__":
    key = jax.random.PRNGKey(0)
    k_param, k_x = jax.random.split(key)
    params = init_params(k_param)
    x = jax.random.normal(k_x, (2, CHANS, IMG, IMG), dtype=jnp.float32)  # NCHW

    fwd = jax.jit(vit_forward)
    out, attn_w = fwd(x, params)
    out = jax.block_until_ready(out)
    attn_w = jax.block_until_ready(attn_w)

    assert out.shape == (2, HIDDEN), out.shape
    assert attn_w.shape == (2, SEQ, SEQ), attn_w.shape
    assert bool(jnp.all(jnp.isfinite(out)))
    assert bool(jnp.all(jnp.isfinite(attn_w)))
    print("KERNEL_OK")
</pallas_src>

<mosaic_0001>
module attributes {stable_mosaic.version = 11 : i64} {
  func.func @_matmul_bias_kernel(%arg0: i32, %arg1: i32, %arg2: memref<8x512xbf16, #tpu.memory_space<vmem>>, %arg3: memref<512x32xbf16, #tpu.memory_space<vmem>>, %arg4: memref<1x32xf32, #tpu.memory_space<vmem>>, %arg5: memref<8x32xbf16, #tpu.memory_space<vmem>>, %arg6: memref<8x32xf32, #tpu.memory_space<vmem>>) attributes {dimension_semantics = [#tpu.dimension_semantics<parallel>, #tpu.dimension_semantics<arbitrary>], iteration_bounds = array<i64: 1, 6>, scalar_prefetch = 0 : i64, scratch_operands = 1 : i64, tpu.core_type = #tpu.core_type<tc>, window_params = [{transform_indices = @transform_0, window_bounds = array<i64: 8, 512>}, {transform_indices = @transform_1, window_bounds = array<i64: 512, 32>}, {pipeline_mode = #tpu.pipeline_mode<synchronous>, transform_indices = @transform_2, window_bounds = array<i64: 1, 32>}, {transform_indices = @transform_3, window_bounds = array<i64: 8, 32>}]} {
    %c0_i32 = arith.constant 0 : i32
    %0 = arith.cmpi eq, %arg1, %c0_i32 : i32
    %1 = arith.extui %0 : i1 to i32
    %c0_i32_0 = arith.constant 0 : i32
    %2 = arith.cmpi ne, %1, %c0_i32_0 : i32
    scf.if %2 {
      %cst_9 = arith.constant 0.000000e+00 : f32
      %12 = vector.broadcast %cst_9 : f32 to vector<8x32xf32>
      %c0_10 = arith.constant 0 : index
      %c0_11 = arith.constant 0 : index
      %13 = vector.load %arg6[%c0_10, %c0_11] : memref<8x32xf32, #tpu.memory_space<vmem>>, vector<8x32xf32>
      tpu.vector_store %arg6[%c0_10, %c0_11], %12 {strides = array<i32>} : memref<8x32xf32, #tpu.memory_space<vmem>>, vector<8x32xf32>,
    } else {
    }
    %c0 = arith.constant 0 : index
    %c0_1 = arith.constant 0 : index
    %3 = vector.load %arg6[%c0, %c0_1] : memref<8x32xf32, #tpu.memory_space<vmem>>, vector<8x32xf32>
    %c0_2 = arith.constant 0 : index
    %c0_3 = arith.constant 0 : index
    %4 = vector.load %arg2[%c0_2, %c0_3] : memref<8x512xbf16, #tpu.memory_space<vmem>>, vector<8x512xbf16>
    %c0_4 = arith.constant 0 : index
    %c0_5 = arith.constant 0 : index
    %5 = vector.load %arg3[%c0_4, %c0_5] : memref<512x32xbf16, #tpu.memory_space<vmem>>, vector<512x32xbf16>
    %cst = arith.constant dense<0.000000e+00> : vector<8x32xf32>
    %6 = tpu.matmul %4, %5, %cst {dimension_numbers = #tpu.dot_dimension_numbers<[1], [0], [0], [1], [0, 0, 1, 1], [], []>} : vector<8x512xbf16>, vector<512x32xbf16>, vector<8x32xf32> -> vector<8x32xf32>
    %7 = arith.addf %3, %6 : vector<8x32xf32>
    %c0_6 = arith.constant 0 : index
    %c0_7 = arith.constant 0 : index
    %8 = vector.load %arg6[%c0_6, %c0_7] : memref<8x32xf32, #tpu.memory_space<vmem>>, vector<8x32xf32>
    tpu.vector_store %arg6[%c0_6, %c0_7], %7 {strides = array<i32>} : memref<8x32xf32, #tpu.memory_space<vmem>>, vector<8x32xf32>,
    %c5_i32 = arith.constant 5 : i32
    %9 = arith.cmpi eq, %arg1, %c5_i32 : i32
    %10 = arith.extui %9 : i1 to i32
    %c0_i32_8 = arith.constant 0 : i32
    %11 = arith.cmpi ne, %10, %c0_i32_8 : i32
    scf.if %11 {
      %c0_9 = arith.constant 0 : index
      %c0_10 = arith.constant 0 : index
      %12 = vector.load %arg6[%c0_9, %c0_10] : memref<8x32xf32, #tpu.memory_space<vmem>>, vector<8x32xf32>
      %c0_11 = arith.constant 0 : index
      %c0_12 = arith.constant 0 : index
      %13 = vector.load %arg4[%c0_11, %c0_12] : memref<1x32xf32, #tpu.memory_space<vmem>>, vector<1x32xf32>
      %14 = vector.broadcast %13 : vector<1x32xf32> to vector<8x32xf32>
      %15 = arith.addf %12, %14 : vector<8x32xf32>
      %16 = arith.truncf %15 : vector<8x32xf32> to vector<8x32xbf16>
      %c0_13 = arith.constant 0 : index
      %c0_14 = arith.constant 0 : index
      %17 = vector.load %arg5[%c0_13, %c0_14] : memref<8x32xbf16, #tpu.memory_space<vmem>>, vector<8x32xbf16>
      tpu.vector_store %arg5[%c0_13, %c0_14], %16 {strides = array<i32>} : memref<8x32xbf16, #tpu.memory_space<vmem>>, vector<8x32xbf16>,
    } else {
    }
    return
  }
  func.func @transform_0(%arg0: i32, %arg1: i32) -> (i32, i32) {
    %c0_i32 = arith.constant 0 : i32
    return %arg0, %arg1 : i32, i32
  }
  func.func @transform_1(%arg0: i32, %arg1: i32) -> (i32, i32) {
    %c0_i32 = arith.constant 0 : i32
    %c0_i32_0 = arith.constant 0 : i32
    return %arg1, %c0_i32 : i32, i32
  }
  func.func @transform_2(%arg0: i32, %arg1: i32) -> (i32, i32) {
    %c0_i32 = arith.constant 0 : i32
    %c0_i32_0 = arith.constant 0 : i32
    %c0_i32_1 = arith.constant 0 : i32
    return %c0_i32, %c0_i32_0 : i32, i32
  }
  func.func @transform_3(%arg0: i32, %arg1: i32) -> (i32, i32) {
    %c0_i32 = arith.constant 0 : i32
    %c0_i32_0 = arith.constant 0 : i32
    return %arg0, %c0_i32 : i32, i32
  }
}

module attributes {stable_mosaic.version = 11 : i64} {
  func.func @_ln_linear_kernel(%arg0: i32, %arg1: memref<8x32xbf16, #tpu.memory_space<vmem>>, %arg2: memref<1x32xf32, #tpu.memory_space<vmem>>, %arg3: memref<1x32xf32, #tpu.memory_space<vmem>>, %arg4: memref<32x96xbf16, #tpu.memory_space<vmem>>, %arg5: memref<1x96xf32, #tpu.memory_space<vmem>>, %arg6: memref<8x96xbf16, #tpu.memory_space<vmem>>) attributes {dimension_semantics = [#tpu.dimension_semantics<parallel>], iteration_bounds = array<i64: 2>, scalar_prefetch = 0 : i64, scratch_operands = 0 : i64, tpu.core_type = #tpu.core_type<tc>, window_params = [{transform_indices = @transform_0, window_bounds = array<i64: 8, 32>}, {pipeline_mode = #tpu.pipeline_mode<synchronous>, transform_indices = @transform_1, window_bounds = array<i64: 1, 32>}, {pipeline_mode = #tpu.pipeline_mode<synchronous>, transform_indices = @transform_2, window_bounds = array<i64: 1, 32>}, {pipeline_mode = #tpu.pipeline_mode<synchronous>, transform_indices = @transform_3, window_bounds = array<i64: 32, 96>}, {pipeline_mode = #tpu.pipeline_mode<synchronous>, transform_indices = @transform_4, window_bounds = array<i64: 1, 96>}, {transform_indices = @transform_5, window_bounds = array<i64: 8, 96>}]} {
    %c0 = arith.constant 0 : index
    %c0_0 = arith.constant 0 : index
    %0 = vector.load %arg1[%c0, %c0_0] : memref<8x32xbf16, #tpu.memory_space<vmem>>, vector<8x32xbf16>
    %1 = arith.extf %0 : vector<8x32xbf16> to vector<8x32xf32>
    %cst = arith.constant dense<0.000000e+00> : vector<8xf32>
    %2 = vector.multi_reduction <add>, %1, %cst [1] : vector<8x32xf32> to vector<8xf32>
    %3 = vector.shape_cast %2 : vector<8xf32> to vector<8x1xf32>
    %cst_1 = arith.constant 3.200000e+01 : f32
    %4 = vector.broadcast %cst_1 : f32 to vector<8x1xf32>
    %5 = arith.divf %3, %4 : vector<8x1xf32>
    %6 = vector.broadcast %5 : vector<8x1xf32> to vector<8x32xf32>
    %7 = arith.subf %1, %6 : vector<8x32xf32>
    %8 = vector.broadcast %5 : vector<8x1xf32> to vector<8x32xf32>
    %9 = arith.subf %1, %8 : vector<8x32xf32>
    %10 = arith.mulf %7, %9 : vector<8x32xf32>
    %cst_2 = arith.constant dense<0.000000e+00> : vector<8xf32>
    %11 = vector.multi_reduction <add>, %10, %cst_2 [1] : vector<8x32xf32> to vector<8xf32>
    %12 = vector.shape_cast %11 : vector<8xf32> to vector<8x1xf32>
    %cst_3 = arith.constant 3.200000e+01 : f32
    %13 = vector.broadcast %cst_3 : f32 to vector<8x1xf32>
    %14 = arith.divf %12, %13 : vector<8x1xf32>
    %15 = vector.broadcast %5 : vector<8x1xf32> to vector<8x32xf32>
    %16 = arith.subf %1, %15 : vector<8x32xf32>
    %cst_4 = arith.constant 9.99999997E-7 : f32
    %17 = vector.broadcast %cst_4 : f32 to vector<8x1xf32>
    %18 = arith.addf %14, %17 : vector<8x1xf32>
    %19 = math.rsqrt %18 : vector<8x1xf32>
    %20 = vector.broadcast %19 : vector<8x1xf32> to vector<8x32xf32>
    %21 = arith.mulf %16, %20 : vector<8x32xf32>
    %c0_5 = arith.constant 0 : index
    %c0_6 = arith.constant 0 : index
    %22 = vector.load %arg2[%c0_5, %c0_6] : memref<1x32xf32, #tpu.memory_space<vmem>>, vector<1x32xf32>
    %23 = vector.broadcast %22 : vector<1x32xf32> to vector<8x32xf32>
    %24 = arith.mulf %21, %23 : vector<8x32xf32>
    %c0_7 = arith.constant 0 : index
    %c0_8 = arith.constant 0 : index
    %25 = vector.load %arg3[%c0_7, %c0_8] : memref<1x32xf32, #tpu.memory_space<vmem>>, vector<1x32xf32>
    %26 = vector.broadcast %25 : vector<1x32xf32> to vector<8x32xf32>
    %27 = arith.addf %24, %26 : vector<8x32xf32>
    %28 = arith.truncf %27 : vector<8x32xf32> to vector<8x32xbf16>
    %c0_9 = arith.constant 0 : index
    %c0_10 = arith.constant 0 : index
    %29 = vector.load %arg4[%c0_9, %c0_10] : memref<32x96xbf16, #tpu.memory_space<vmem>>, vector<32x96xbf16>
    %cst_11 = arith.constant dense<0.000000e+00> : vector<8x96xf32>
    %30 = tpu.matmul %28, %29, %cst_11 {dimension_numbers = #tpu.dot_dimension_numbers<[1], [0], [0], [1], [0, 0, 1, 1], [], []>} : vector<8x32xbf16>, vector<32x96xbf16>, vector<8x96xf32> -> vector<8x96xf32>
    %c0_12 = arith.constant 0 : index
    %c0_13 = arith.constant 0 : index
    %31 = vector.load %arg5[%c0_12, %c0_13] : memref<1x96xf32, #tpu.memory_space<vmem>>, vector<1x96xf32>
    %32 = vector.broadcast %31 : vector<1x96xf32> to vector<8x96xf32>
    %33 = arith.addf %30, %32 : vector<8x96xf32>
    %34 = arith.truncf %33 : vector<8x96xf32> to vector<8x96xbf16>
    %c0_14 = arith.constant 0 : index
    %c0_15 = arith.constant 0 : index
    %35 = vector.load %arg6[%c0_14, %c0_15] : memref<8x96xbf16, #tpu.memory_space<vmem>>, vector<8x96xbf16>
    tpu.vector_store %arg6[%c0_14, %c0_15], %34 {strides = array<i32>} : memref<8x96xbf16, #tpu.memory_space<vmem>>, vector<8x96xbf16>,
    return
  }
  func.func @transform_0(%arg0: i32) -> (i32, i32) {
    %c0_i32 = arith.constant 0 : i32
    %c0_i32_0 = arith.constant 0 : i32
    return %arg0, %c0_i32 : i32, i32
  }
  func.func @transform_1(%arg0: i32) -> (i32, i32) {
    %c0_i32 = arith.constant 0 : i32
    %c0_i32_0 = arith.constant 0 : i32
    %c0_i32_1 = arith.constant 0 : i32
    return %c0_i32, %c0_i32_0 : i32, i32
  }
  func.func @transform_2(%arg0: i32) -> (i32, i32) {
    %c0_i32 = arith.constant 0 : i32
    %c0_i32_0 = arith.constant 0 : i32
    %c0_i32_1 = arith.constant 0 : i32
    return %c0_i32, %c0_i32_0 : i32, i32
  }
  func.func @transform_3(%arg0: i32) -> (i32, i32) {
    %c0_i32 = arith.constant 0 : i32
    %c0_i32_0 = arith.constant 0 : i32
    %c0_i32_1 = arith.constant 0 : i32
    return %c0_i32, %c0_i32_0 : i32, i32
  }
  func.func @transform_4(%arg0: i32) -> (i32, i32) {
    %c0_i32 = arith.constant 0 : i32
    %c0_i32_0 = arith.constant 0 : i32
    %c0_i32_1 = arith.constant 0 : i32
    return %c0_i32, %c0_i32_0 : i32, i32
  }
  func.func @transform_5(%arg0: i32) -> (i32, i32) {
    %c0_i32 = arith.constant 0 : i32
    %c0_i32_0 = arith.constant 0 : i32
    return %arg0, %c0_i32 : i32, i32
  }
}

module attributes {stable_mosaic.version = 11 : i64} {
  func.func @_attn_kernel(%arg0: i32, %arg1: memref<1x5x96xbf16, #tpu.memory_space<vmem>>, %arg2: memref<1x5x32xbf16, #tpu.memory_space<vmem>>) attributes {dimension_semantics = [#tpu.dimension_semantics<parallel>], iteration_bounds = array<i64: 2>, scalar_prefetch = 0 : i64, scratch_operands = 0 : i64, tpu.core_type = #tpu.core_type<tc>, window_params = [{transform_indices = @transform_0, window_bounds = array<i64: 1, 5, 96>}, {transform_indices = @transform_1, window_bounds = array<i64: 1, 5, 32>}]} {
    %c0 = arith.constant 0 : index
    %c0_0 = arith.constant 0 : index
    %c0_1 = arith.constant 0 : index
    %0 = vector.load %arg1[%c0, %c0_0, %c0_1] : memref<1x5x96xbf16, #tpu.memory_space<vmem>>, vector<1x5x96xbf16>
    %1 = vector.shape_cast %0 : vector<1x5x96xbf16> to vector<5x96xbf16>
    %2 = vector.extract_strided_slice %1 {offsets = [0, 0], sizes = [5, 8], strides = [1, 1]} : vector<5x96xbf16> to vector<5x8xbf16>
    %3 = vector.extract_strided_slice %1 {offsets = [0, 32], sizes = [5, 8], strides = [1, 1]} : vector<5x96xbf16> to vector<5x8xbf16>
    %4 = vector.extract_strided_slice %1 {offsets = [0, 64], sizes = [5, 8], strides = [1, 1]} : vector<5x96xbf16> to vector<5x8xbf16>
    %cst = arith.constant dense<0.000000e+00> : vector<5x5xf32>
    %5 = tpu.matmul %2, %3, %cst {dimension_numbers = #tpu.dot_dimension_numbers<[1], [1], [0], [0], [0, 0, 1, 0], [], []>} : vector<5x8xbf16>, vector<5x8xbf16>, vector<5x5xf32> -> vector<5x5xf32>
    %cst_2 = arith.constant 0.353553385 : f32
    %6 = vector.broadcast %cst_2 : f32 to vector<5x5xf32>
    %7 = arith.mulf %5, %6 : vector<5x5xf32>
    %cst_3 = arith.constant dense<0xFF800000> : vector<5xf32>
    %8 = vector.multi_reduction <maximumf>, %7, %cst_3 [1] : vector<5x5xf32> to vector<5xf32>
    %9 = vector.shape_cast %8 : vector<5xf32> to vector<5x1xf32>
    %10 = vector.broadcast %9 : vector<5x1xf32> to vector<5x5xf32>
    %11 = arith.subf %7, %10 : vector<5x5xf32>
    %12 = math.exp %11 : vector<5x5xf32>
    %cst_4 = arith.constant dense<0.000000e+00> : vector<5xf32>
    %13 = vector.multi_reduction <add>, %12, %cst_4 [1] : vector<5x5xf32> to vector<5xf32>
    %14 = vector.shape_cast %13 : vector<5xf32> to vector<5x1xf32>
    %15 = tpu.reciprocal %14 {approx = true} : vector<5x1xf32> -> vector<5x1xf32>
    %16 = vector.broadcast %15 : vector<5x1xf32> to vector<5x5xf32>
    %17 = arith.mulf %12, %16 : vector<5x5xf32>
    %18 = arith.truncf %17 : vector<5x5xf32> to vector<5x5xbf16>
    %cst_5 = arith.constant dense<0.000000e+00> : vector<5x8xf32>
    %19 = tpu.matmul %18, %4, %cst_5 {dimension_numbers = #tpu.dot_dimension_numbers<[1], [0], [0], [1], [0, 0, 1, 1], [], []>} : vector<5x5xbf16>, vector<5x8xbf16>, vector<5x8xf32> -> vector<5x8xf32>
    %20 = vector.extract_strided_slice %1 {offsets = [0, 8], sizes = [5, 8], strides = [1, 1]} : vector<5x96xbf16> to vector<5x8xbf16>
    %21 = vector.extract_strided_slice %1 {offsets = [0, 40], sizes = [5, 8], strides = [1, 1]} : vector<5x96xbf16> to vector<5x8xbf16>
    %22 = vector.extract_strided_slice %1 {offsets = [0, 72], sizes = [5, 8], strides = [1, 1]} : vector<5x96xbf16> to vector<5x8xbf16>
    %cst_6 = arith.constant dense<0.000000e+00> : vector<5x5xf32>
    %23 = tpu.matmul %20, %21, %cst_6 {dimension_numbers = #tpu.dot_dimension_numbers<[1], [1], [0], [0], [0, 0, 1, 0], [], []>} : vector<5x8xbf16>, vector<5x8xbf16>, vector<5x5xf32> -> vector<5x5xf32>
    %cst_7 = arith.constant 0.353553385 : f32
    %24 = vector.broadcast %cst_7 : f32 to vector<5x5xf32>
    %25 = arith.mulf %23, %24 : vector<5x5xf32>
    %cst_8 = arith.constant dense<0xFF800000> : vector<5xf32>
    %26 = vector.multi_reduction <maximumf>, %25, %cst_8 [1] : vector<5x5xf32> to vector<5xf32>
    %27 = vector.shape_cast %26 : vector<5xf32> to vector<5x1xf32>
    %28 = vector.broadcast %27 : vector<5x1xf32> to vector<5x5xf32>
    %29 = arith.subf %25, %28 : vector<5x5xf32>
    %30 = math.exp %29 : vector<5x5xf32>
    %cst_9 = arith.constant dense<0.000000e+00> : vector<5xf32>
    %31 = vector.multi_reduction <add>, %30, %cst_9 [1] : vector<5x5xf32> to vector<5xf32>
    %32 = vector.shape_cast %31 : vector<5xf32> to vector<5x1xf32>
    %33 = tpu.reciprocal %32 {approx = true} : vector<5x1xf32> -> vector<5x1xf32>
    %34 = vector.broadcast %33 : vector<5x1xf32> to vector<5x5xf32>
    %35 = arith.mulf %30, %34 : vector<5x5xf32>
    %36 = arith.truncf %35 : vector<5x5xf32> to vector<5x5xbf16>
    %cst_10 = arith.constant dense<0.000000e+00> : vector<5x8xf32>
    %37 = tpu.matmul %36, %22, %cst_10 {dimension_numbers = #tpu.dot_dimension_numbers<[1], [0], [0], [1], [0, 0, 1, 1], [], []>} : vector<5x5xbf16>, vector<5x8xbf16>, vector<5x8xf32> -> vector<5x8xf32>
    %38 = vector.extract_strided_slice %1 {offsets = [0, 16], sizes = [5, 8], strides = [1, 1]} : vector<5x96xbf16> to vector<5x8xbf16>
    %39 = vector.extract_strided_slice %1 {offsets = [0, 48], sizes = [5, 8], strides = [1, 1]} : vector<5x96xbf16> to vector<5x8xbf16>
    %40 = vector.extract_strided_slice %1 {offsets = [0, 80], sizes = [5, 8], strides = [1, 1]} : vector<5x96xbf16> to vector<5x8xbf16>
    %cst_11 = arith.constant dense<0.000000e+00> : vector<5x5xf32>
    %41 = tpu.matmul %38, %39, %cst_11 {dimension_numbers = #tpu.dot_dimension_numbers<[1], [1], [0], [0], [0, 0, 1, 0], [], []>} : vector<5x8xbf16>, vector<5x8xbf16>, vector<5x5xf32> -> vector<5x5xf32>
    %cst_12 = arith.constant 0.353553385 : f32
    %42 = vector.broadcast %cst_12 : f32 to vector<5x5xf32>
    %43 = arith.mulf %41, %42 : vector<5x5xf32>
    %cst_13 = arith.constant dense<0xFF800000> : vector<5xf32>
    %44 = vector.multi_reduction <maximumf>, %43, %cst_13 [1] : vector<5x5xf32> to vector<5xf32>
    %45 = vector.shape_cast %44 : vector<5xf32> to vector<5x1xf32>
    %46 = vector.broadcast %45 : vector<5x1xf32> to vector<5x5xf32>
    %47 = arith.subf %43, %46 : vector<5x5xf32>
    %48 = math.exp %47 : vector<5x5xf32>
    %cst_14 = arith.constant dense<0.000000e+00> : vector<5xf32>
    %49 = vector.multi_reduction <add>, %48, %cst_14 [1] : vector<5x5xf32> to vector<5xf32>
    %50 = vector.shape_cast %49 : vector<5xf32> to vector<5x1xf32>
    %51 = tpu.reciprocal %50 {approx = true} : vector<5x1xf32> -> vector<5x1xf32>
    %52 = vector.broadcast %51 : vector<5x1xf32> to vector<5x5xf32>
    %53 = arith.mulf %48, %52 : vector<5x5xf32>
    %54 = arith.truncf %53 : vector<5x5xf32> to vector<5x5xbf16>
    %cst_15 = arith.constant dense<0.000000e+00> : vector<5x8xf32>
    %55 = tpu.matmul %54, %40, %cst_15 {dimension_numbers = #tpu.dot_dimension_numbers<[1], [0], [0], [1], [0, 0, 1, 1], [], []>} : vector<5x5xbf16>, vector<5x8xbf16>, vector<5x8xf32> -> vector<5x8xf32>
    %56 = vector.extract_strided_slice %1 {offsets = [0, 24], sizes = [5, 8], strides = [1, 1]} : vector<5x96xbf16> to vector<5x8xbf16>
    %57 = vector.extract_strided_slice %1 {offsets = [0, 56], sizes = [5, 8], strides = [1, 1]} : vector<5x96xbf16> to vector<5x8xbf16>
    %58 = vector.extract_strided_slice %1 {offsets = [0, 88], sizes = [5, 8], strides = [1, 1]} : vector<5x96xbf16> to vector<5x8xbf16>
    %cst_16 = arith.constant dense<0.000000e+00> : vector<5x5xf32>
    %59 = tpu.matmul %56, %57, %cst_16 {dimension_numbers = #tpu.dot_dimension_numbers<[1], [1], [0], [0], [0, 0, 1, 0], [], []>} : vector<5x8xbf16>, vector<5x8xbf16>, vector<5x5xf32> -> vector<5x5xf32>
    %cst_17 = arith.constant 0.353553385 : f32
    %60 = vector.broadcast %cst_17 : f32 to vector<5x5xf32>
    %61 = arith.mulf %59, %60 : vector<5x5xf32>
    %cst_18 = arith.constant dense<0xFF800000> : vector<5xf32>
    %62 = vector.multi_reduction <maximumf>, %61, %cst_18 [1] : vector<5x5xf32> to vector<5xf32>
    %63 = vector.shape_cast %62 : vector<5xf32> to vector<5x1xf32>
    %64 = vector.broadcast %63 : vector<5x1xf32> to vector<5x5xf32>
    %65 = arith.subf %61, %64 : vector<5x5xf32>
    %66 = math.exp %65 : vector<5x5xf32>
    %cst_19 = arith.constant dense<0.000000e+00> : vector<5xf32>
    %67 = vector.multi_reduction <add>, %66, %cst_19 [1] : vector<5x5xf32> to vector<5xf32>
    %68 = vector.shape_cast %67 : vector<5xf32> to vector<5x1xf32>
    %69 = tpu.reciprocal %68 {approx = true} : vector<5x1xf32> -> vector<5x1xf32>
    %70 = vector.broadcast %69 : vector<5x1xf32> to vector<5x5xf32>
    %71 = arith.mulf %66, %70 : vector<5x5xf32>
    %72 = arith.truncf %71 : vector<5x5xf32> to vector<5x5xbf16>
    %cst_20 = arith.constant dense<0.000000e+00> : vector<5x8xf32>
    %73 = tpu.matmul %72, %58, %cst_20 {dimension_numbers = #tpu.dot_dimension_numbers<[1], [0], [0], [1], [0, 0, 1, 1], [], []>} : vector<5x5xbf16>, vector<5x8xbf16>, vector<5x8xf32> -> vector<5x8xf32>
    %74 = tpu.concatenate %19, %37, %55, %73 in 1 : vector<5x8xf32>, vector<5x8xf32>, vector<5x8xf32>, vector<5x8xf32> -> vector<5x32xf32>
    %75 = arith.truncf %74 : vector<5x32xf32> to vector<5x32xbf16>
    %c0_21 = arith.constant 0 : index
    %c0_22 = arith.constant 0 : index
    %c0_23 = arith.constant 0 : index
    %76 = vector.load %arg2[%c0_21, %c0_22, %c0_23] : memref<1x5x32xbf16, #tpu.memory_space<vmem>>, vector<1x5x32xbf16>
    %77 = vector.shape_cast %76 : vector<1x5x32xbf16> to vector<5x32xbf16>
    %78 = vector.shape_cast %75 : vector<5x32xbf16> to vector<1x5x32xbf16>
    tpu.vector_store %arg2[%c0_21, %c0_22, %c0_23], %78 {strides = array<i32>} : memref<1x5x32xbf16, #tpu.memory_space<vmem>>, vector<1x5x32xbf16>,
    return
  }
  func.func @transform_0(%arg0: i32) -> (i32, i32, i32) {
    %c0_i32 = arith.constant 0 : i32
    %c0_i32_0 = arith.constant 0 : i32
    %c0_i32_1 = arith.constant 0 : i32
    return %arg0, %c0_i32, %c0_i32_0 : i32, i32, i32
  }
  func.func @transform_1(%arg0: i32) -> (i32, i32, i32) {
    %c0_i32 = arith.constant 0 : i32
    %c0_i32_0 = arith.constant 0 : i32
    %c0_i32_1 = arith.constant 0 : i32
    return %arg0, %c0_i32, %c0_i32_0 : i32, i32, i32
  }
}

module attributes {stable_mosaic.version = 11 : i64} {
  func.func @_linear_residual_kernel(%arg0: i32, %arg1: memref<8x32xbf16, #tpu.memory_space<vmem>>, %arg2: memref<32x32xbf16, #tpu.memory_space<vmem>>, %arg3: memref<1x32xf32, #tpu.memory_space<vmem>>, %arg4: memref<8x32xbf16, #tpu.memory_space<vmem>>, %arg5: memref<8x32xbf16, #tpu.memory_space<vmem>>) attributes {dimension_semantics = [#tpu.dimension_semantics<parallel>], iteration_bounds = array<i64: 2>, scalar_prefetch = 0 : i64, scratch_operands = 0 : i64, tpu.core_type = #tpu.core_type<tc>, window_params = [{transform_indices = @transform_0, window_bounds = array<i64: 8, 32>}, {pipeline_mode = #tpu.pipeline_mode<synchronous>, transform_indices = @transform_1, window_bounds = array<i64: 32, 32>}, {pipeline_mode = #tpu.pipeline_mode<synchronous>, transform_indices = @transform_2, window_bounds = array<i64: 1, 32>}, {transform_indices = @transform_3, window_bounds = array<i64: 8, 32>}, {transform_indices = @transform_4, window_bounds = array<i64: 8, 32>}]} {
    %c0 = arith.constant 0 : index
    %c0_0 = arith.constant 0 : index
    %0 = vector.load %arg1[%c0, %c0_0] : memref<8x32xbf16, #tpu.memory_space<vmem>>, vector<8x32xbf16>
    %c0_1 = arith.constant 0 : index
    %c0_2 = arith.constant 0 : index
    %1 = vector.load %arg2[%c0_1, %c0_2] : memref<32x32xbf16, #tpu.memory_space<vmem>>, vector<32x32xbf16>
    %cst = arith.constant dense<0.000000e+00> : vector<8x32xf32>
    %2 = tpu.matmul %0, %1, %cst {dimension_numbers = #tpu.dot_dimension_numbers<[1], [0], [0], [1], [0, 0, 1, 1], [], []>} : vector<8x32xbf16>, vector<32x32xbf16>, vector<8x32xf32> -> vector<8x32xf32>
    %c0_3 = arith.constant 0 : index
    %c0_4 = arith.constant 0 : index
    %3 = vector.load %arg3[%c0_3, %c0_4] : memref<1x32xf32, #tpu.memory_space<vmem>>, vector<1x32xf32>
    %4 = vector.broadcast %3 : vector<1x32xf32> to vector<8x32xf32>
    %5 = arith.addf %2, %4 : vector<8x32xf32>
    %c0_5 = arith.constant 0 : index
    %c0_6 = arith.constant 0 : index
    %6 = vector.load %arg4[%c0_5, %c0_6] : memref<8x32xbf16, #tpu.memory_space<vmem>>, vector<8x32xbf16>
    %7 = arith.extf %6 : vector<8x32xbf16> to vector<8x32xf32>
    %8 = arith.addf %5, %7 : vector<8x32xf32>
    %9 = arith.truncf %8 : vector<8x32xf32> to vector<8x32xbf16>
    %c0_7 = arith.constant 0 : index
    %c0_8 = arith.constant 0 : index
    %10 = vector.load %arg5[%c0_7, %c0_8] : memref<8x32xbf16, #tpu.memory_space<vmem>>, vector<8x32xbf16>
    tpu.vector_store %arg5[%c0_7, %c0_8], %9 {strides = array<i32>} : memref<8x32xbf16, #tpu.memory_space<vmem>>, vector<8x32xbf16>,
    return
  }
  func.func @transform_0(%arg0: i32) -> (i32, i32) {
    %c0_i32 = arith.constant 0 : i32
    %c0_i32_0 = arith.constant 0 : i32
    return %arg0, %c0_i32 : i32, i32
  }
  func.func @transform_1(%arg0: i32) -> (i32, i32) {
    %c0_i32 = arith.constant 0 : i32
    %c0_i32_0 = arith.constant 0 : i32
    %c0_i32_1 = arith.constant 0 : i32
    return %c0_i32, %c0_i32_0 : i32, i32
  }
  func.func @transform_2(%arg0: i32) -> (i32, i32) {
    %c0_i32 = arith.constant 0 : i32
    %c0_i32_0 = arith.constant 0 : i32
    %c0_i32_1 = arith.constant 0 : i32
    return %c0_i32, %c0_i32_0 : i32, i32
  }
  func.func @transform_3(%arg0: i32) -> (i32, i32) {
    %c0_i32 = arith.constant 0 : i32
    %c0_i32_0 = arith.constant 0 : i32
    return %arg0, %c0_i32 : i32, i32
  }
  func.func @transform_4(%arg0: i32) -> (i32, i32) {
    %c0_i32 = arith.constant 0 : i32
    %c0_i32_0 = arith.constant 0 : i32
    return %arg0, %c0_i32 : i32, i32
  }
}

module attributes {stable_mosaic.version = 11 : i64} {
  func.func @_ln_linear_kernel(%arg0: i32, %arg1: memref<8x32xbf16, #tpu.memory_space<vmem>>, %arg2: memref<1x32xf32, #tpu.memory_space<vmem>>, %arg3: memref<1x32xf32, #tpu.memory_space<vmem>>, %arg4: memref<32x64xbf16, #tpu.memory_space<vmem>>, %arg5: memref<1x64xf32, #tpu.memory_space<vmem>>, %arg6: memref<8x64xbf16, #tpu.memory_space<vmem>>) attributes {dimension_semantics = [#tpu.dimension_semantics<parallel>], iteration_bounds = array<i64: 2>, scalar_prefetch = 0 : i64, scratch_operands = 0 : i64, tpu.core_type = #tpu.core_type<tc>, window_params = [{transform_indices = @transform_0, window_bounds = array<i64: 8, 32>}, {pipeline_mode = #tpu.pipeline_mode<synchronous>, transform_indices = @transform_1, window_bounds = array<i64: 1, 32>}, {pipeline_mode = #tpu.pipeline_mode<synchronous>, transform_indices = @transform_2, window_bounds = array<i64: 1, 32>}, {pipeline_mode = #tpu.pipeline_mode<synchronous>, transform_indices = @transform_3, window_bounds = array<i64: 32, 64>}, {pipeline_mode = #tpu.pipeline_mode<synchronous>, transform_indices = @transform_4, window_bounds = array<i64: 1, 64>}, {transform_indices = @transform_5, window_bounds = array<i64: 8, 64>}]} {
    %c0 = arith.constant 0 : index
    %c0_0 = arith.constant 0 : index
    %0 = vector.load %arg1[%c0, %c0_0] : memref<8x32xbf16, #tpu.memory_space<vmem>>, vector<8x32xbf16>
    %1 = arith.extf %0 : vector<8x32xbf16> to vector<8x32xf32>
    %cst = arith.constant dense<0.000000e+00> : vector<8xf32>
    %2 = vector.multi_reduction <add>, %1, %cst [1] : vector<8x32xf32> to vector<8xf32>
    %3 = vector.shape_cast %2 : vector<8xf32> to vector<8x1xf32>
    %cst_1 = arith.constant 3.200000e+01 : f32
    %4 = vector.broadcast %cst_1 : f32 to vector<8x1xf32>
    %5 = arith.divf %3, %4 : vector<8x1xf32>
    %6 = vector.broadcast %5 : vector<8x1xf32> to vector<8x32xf32>
    %7 = arith.subf %1, %6 : vector<8x32xf32>
    %8 = vector.broadcast %5 : vector<8x1xf32> to vector<8x32xf32>
    %9 = arith.subf %1, %8 : vector<8x32xf32>
    %10 = arith.mulf %7, %9 : vector<8x32xf32>
    %cst_2 = arith.constant dense<0.000000e+00> : vector<8xf32>
    %11 = vector.multi_reduction <add>, %10, %cst_2 [1] : vector<8x32xf32> to vector<8xf32>
    %12 = vector.shape_cast %11 : vector<8xf32> to vector<8x1xf32>
    %cst_3 = arith.constant 3.200000e+01 : f32
    %13 = vector.broadcast %cst_3 : f32 to vector<8x1xf32>
    %14 = arith.divf %12, %13 : vector<8x1xf32>
    %15 = vector.broadcast %5 : vector<8x1xf32> to vector<8x32xf32>
    %16 = arith.subf %1, %15 : vector<8x32xf32>
    %cst_4 = arith.constant 9.99999997E-7 : f32
    %17 = vector.broadcast %cst_4 : f32 to vector<8x1xf32>
    %18 = arith.addf %14, %17 : vector<8x1xf32>
    %19 = math.rsqrt %18 : vector<8x1xf32>
    %20 = vector.broadcast %19 : vector<8x1xf32> to vector<8x32xf32>
    %21 = arith.mulf %16, %20 : vector<8x32xf32>
    %c0_5 = arith.constant 0 : index
    %c0_6 = arith.constant 0 : index
    %22 = vector.load %arg2[%c0_5, %c0_6] : memref<1x32xf32, #tpu.memory_space<vmem>>, vector<1x32xf32>
    %23 = vector.broadcast %22 : vector<1x32xf32> to vector<8x32xf32>
    %24 = arith.mulf %21, %23 : vector<8x32xf32>
    %c0_7 = arith.constant 0 : index
    %c0_8 = arith.constant 0 : index
    %25 = vector.load %arg3[%c0_7, %c0_8] : memref<1x32xf32, #tpu.memory_space<vmem>>, vector<1x32xf32>
    %26 = vector.broadcast %25 : vector<1x32xf32> to vector<8x32xf32>
    %27 = arith.addf %24, %26 : vector<8x32xf32>
    %28 = arith.truncf %27 : vector<8x32xf32> to vector<8x32xbf16>
    %c0_9 = arith.constant 0 : index
    %c0_10 = arith.constant 0 : index
    %29 = vector.load %arg4[%c0_9, %c0_10] : memref<32x64xbf16, #tpu.memory_space<vmem>>, vector<32x64xbf16>
    %cst_11 = arith.constant dense<0.000000e+00> : vector<8x64xf32>
    %30 = tpu.matmul %28, %29, %cst_11 {dimension_numbers = #tpu.dot_dimension_numbers<[1], [0], [0], [1], [0, 0, 1, 1], [], []>} : vector<8x32xbf16>, vector<32x64xbf16>, vector<8x64xf32> -> vector<8x64xf32>
    %c0_12 = arith.constant 0 : index
    %c0_13 = arith.constant 0 : index
    %31 = vector.load %arg5[%c0_12, %c0_13] : memref<1x64xf32, #tpu.memory_space<vmem>>, vector<1x64xf32>
    %32 = vector.broadcast %31 : vector<1x64xf32> to vector<8x64xf32>
    %33 = arith.addf %30, %32 : vector<8x64xf32>
    %cst_14 = arith.constant 5.000000e-01 : f32
    %34 = vector.broadcast %cst_14 : f32 to vector<8x64xf32>
    %35 = arith.mulf %34, %33 : vector<8x64xf32>
    %cst_15 = arith.constant 0.707106769 : f32
    %36 = vector.broadcast %cst_15 : f32 to vector<8x64xf32>
    %37 = arith.mulf %33, %36 : vector<8x64xf32>
    %38 = math.erf %37 : vector<8x64xf32>
    %cst_16 = arith.constant 1.000000e+00 : f32
    %39 = vector.broadcast %cst_16 : f32 to vector<8x64xf32>
    %40 = arith.addf %39, %38 : vector<8x64xf32>
    %41 = arith.mulf %35, %40 : vector<8x64xf32>
    %42 = arith.truncf %41 : vector<8x64xf32> to vector<8x64xbf16>
    %c0_17 = arith.constant 0 : index
    %c0_18 = arith.constant 0 : index
    %43 = vector.load %arg6[%c0_17, %c0_18] : memref<8x64xbf16, #tpu.memory_space<vmem>>, vector<8x64xbf16>
    tpu.vector_store %arg6[%c0_17, %c0_18], %42 {strides = array<i32>} : memref<8x64xbf16, #tpu.memory_space<vmem>>, vector<8x64xbf16>,
    return
  }
  func.func @transform_0(%arg0: i32) -> (i32, i32) {
    %c0_i32 = arith.constant 0 : i32
    %c0_i32_0 = arith.constant 0 : i32
    return %arg0, %c0_i32 : i32, i32
  }
  func.func @transform_1(%arg0: i32) -> (i32, i32) {
    %c0_i32 = arith.constant 0 : i32
    %c0_i32_0 = arith.constant 0 : i32
    %c0_i32_1 = arith.constant 0 : i32
    return %c0_i32, %c0_i32_0 : i32, i32
  }
  func.func @transform_2(%arg0: i32) -> (i32, i32) {
    %c0_i32 = arith.constant 0 : i32
    %c0_i32_0 = arith.constant 0 : i32
    %c0_i32_1 = arith.constant 0 : i32
    return %c0_i32, %c0_i32_0 : i32, i32
  }
  func.func @transform_3(%arg0: i32) -> (i32, i32) {
    %c0_i32 = arith.constant 0 : i32
    %c0_i32_0 = arith.constant 0 : i32
    %c0_i32_1 = arith.constant 0 : i32
    return %c0_i32, %c0_i32_0 : i32, i32
  }
  func.func @transform_4(%arg0: i32) -> (i32, i32) {
    %c0_i32 = arith.constant 0 : i32
    %c0_i32_0 = arith.constant 0 : i32
    %c0_i32_1 = arith.constant 0 : i32
    return %c0_i32, %c0_i32_0 : i32, i32
  }
  func.func @transform_5(%arg0: i32) -> (i32, i32) {
    %c0_i32 = arith.constant 0 : i32
    %c0_i32_0 = arith.constant 0 : i32
    return %arg0, %c0_i32 : i32, i32
  }
}

module attributes {stable_mosaic.version = 11 : i64} {
  func.func @_attn_kernel(%arg0: i32, %arg1: memref<1x5x96xbf16, #tpu.memory_space<vmem>>, %arg2: memref<1x5x32xbf16, #tpu.memory_space<vmem>>, %arg3: memref<1x5x5xf32, #tpu.memory_space<vmem>>) attributes {dimension_semantics = [#tpu.dimension_semantics<parallel>], iteration_bounds = array<i64: 2>, scalar_prefetch = 0 : i64, scratch_operands = 0 : i64, tpu.core_type = #tpu.core_type<tc>, window_params = [{transform_indices = @transform_0, window_bounds = array<i64: 1, 5, 96>}, {transform_indices = @transform_1, window_bounds = array<i64: 1, 5, 32>}, {transform_indices = @transform_2, window_bounds = array<i64: 1, 5, 5>}]} {
    %c0 = arith.constant 0 : index
    %c0_0 = arith.constant 0 : index
    %c0_1 = arith.constant 0 : index
    %0 = vector.load %arg1[%c0, %c0_0, %c0_1] : memref<1x5x96xbf16, #tpu.memory_space<vmem>>, vector<1x5x96xbf16>
    %1 = vector.shape_cast %0 : vector<1x5x96xbf16> to vector<5x96xbf16>
    %cst = arith.constant 0.000000e+00 : f32
    %2 = vector.broadcast %cst : f32 to vector<5x5xf32>
    %3 = vector.extract_strided_slice %1 {offsets = [0, 0], sizes = [5, 8], strides = [1, 1]} : vector<5x96xbf16> to vector<5x8xbf16>
    %4 = vector.extract_strided_slice %1 {offsets = [0, 32], sizes = [5, 8], strides = [1, 1]} : vector<5x96xbf16> to vector<5x8xbf16>
    %5 = vector.extract_strided_slice %1 {offsets = [0, 64], sizes = [5, 8], strides = [1, 1]} : vector<5x96xbf16> to vector<5x8xbf16>
    %cst_2 = arith.constant dense<0.000000e+00> : vector<5x5xf32>
    %6 = tpu.matmul %3, %4, %cst_2 {dimension_numbers = #tpu.dot_dimension_numbers<[1], [1], [0], [0], [0, 0, 1, 0], [], []>} : vector<5x8xbf16>, vector<5x8xbf16>, vector<5x5xf32> -> vector<5x5xf32>
    %cst_3 = arith.constant 0.353553385 : f32
    %7 = vector.broadcast %cst_3 : f32 to vector<5x5xf32>
    %8 = arith.mulf %6, %7 : vector<5x5xf32>
    %cst_4 = arith.constant dense<0xFF800000> : vector<5xf32>
    %9 = vector.multi_reduction <maximumf>, %8, %cst_4 [1] : vector<5x5xf32> to vector<5xf32>
    %10 = vector.shape_cast %9 : vector<5xf32> to vector<5x1xf32>
    %11 = vector.broadcast %10 : vector<5x1xf32> to vector<5x5xf32>
    %12 = arith.subf %8, %11 : vector<5x5xf32>
    %13 = math.exp %12 : vector<5x5xf32>
    %cst_5 = arith.constant dense<0.000000e+00> : vector<5xf32>
    %14 = vector.multi_reduction <add>, %13, %cst_5 [1] : vector<5x5xf32> to vector<5xf32>
    %15 = vector.shape_cast %14 : vector<5xf32> to vector<5x1xf32>
    %16 = tpu.reciprocal %15 {approx = true} : vector<5x1xf32> -> vector<5x1xf32>
    %17 = vector.broadcast %16 : vector<5x1xf32> to vector<5x5xf32>
    %18 = arith.mulf %13, %17 : vector<5x5xf32>
    %19 = arith.addf %2, %18 : vector<5x5xf32>
    %20 = arith.truncf %18 : vector<5x5xf32> to vector<5x5xbf16>
    %cst_6 = arith.constant dense<0.000000e+00> : vector<5x8xf32>
    %21 = tpu.matmul %20, %5, %cst_6 {dimension_numbers = #tpu.dot_dimension_numbers<[1], [0], [0], [1], [0, 0, 1, 1], [], []>} : vector<5x5xbf16>, vector<5x8xbf16>, vector<5x8xf32> -> vector<5x8xf32>
    %22 = vector.extract_strided_slice %1 {offsets = [0, 8], sizes = [5, 8], strides = [1, 1]} : vector<5x96xbf16> to vector<5x8xbf16>
    %23 = vector.extract_strided_slice %1 {offsets = [0, 40], sizes = [5, 8], strides = [1, 1]} : vector<5x96xbf16> to vector<5x8xbf16>
    %24 = vector.extract_strided_slice %1 {offsets = [0, 72], sizes = [5, 8], strides = [1, 1]} : vector<5x96xbf16> to vector<5x8xbf16>
    %cst_7 = arith.constant dense<0.000000e+00> : vector<5x5xf32>
    %25 = tpu.matmul %22, %23, %cst_7 {dimension_numbers = #tpu.dot_dimension_numbers<[1], [1], [0], [0], [0, 0, 1, 0], [], []>} : vector<5x8xbf16>, vector<5x8xbf16>, vector<5x5xf32> -> vector<5x5xf32>
    %cst_8 = arith.constant 0.353553385 : f32
    %26 = vector.broadcast %cst_8 : f32 to vector<5x5xf32>
    %27 = arith.mulf %25, %26 : vector<5x5xf32>
    %cst_9 = arith.constant dense<0xFF800000> : vector<5xf32>
    %28 = vector.multi_reduction <maximumf>, %27, %cst_9 [1] : vector<5x5xf32> to vector<5xf32>
    %29 = vector.shape_cast %28 : vector<5xf32> to vector<5x1xf32>
    %30 = vector.broadcast %29 : vector<5x1xf32> to vector<5x5xf32>
    %31 = arith.subf %27, %30 : vector<5x5xf32>
    %32 = math.exp %31 : vector<5x5xf32>
    %cst_10 = arith.constant dense<0.000000e+00> : vector<5xf32>
    %33 = vector.multi_reduction <add>, %32, %cst_10 [1] : vector<5x5xf32> to vector<5xf32>
    %34 = vector.shape_cast %33 : vector<5xf32> to vector<5x1xf32>
    %35 = tpu.reciprocal %34 {approx = true} : vector<5x1xf32> -> vector<5x1xf32>
    %36 = vector.broadcast %35 : vector<5x1xf32> to vector<5x5xf32>
    %37 = arith.mulf %32, %36 : vector<5x5xf32>
    %38 = arith.addf %19, %37 : vector<5x5xf32>
    %39 = arith.truncf %37 : vector<5x5xf32> to vector<5x5xbf16>
    %cst_11 = arith.constant dense<0.000000e+00> : vector<5x8xf32>
    %40 = tpu.matmul %39, %24, %cst_11 {dimension_numbers = #tpu.dot_dimension_numbers<[1], [0], [0], [1], [0, 0, 1, 1], [], []>} : vector<5x5xbf16>, vector<5x8xbf16>, vector<5x8xf32> -> vector<5x8xf32>
    %41 = vector.extract_strided_slice %1 {offsets = [0, 16], sizes = [5, 8], strides = [1, 1]} : vector<5x96xbf16> to vector<5x8xbf16>
    %42 = vector.extract_strided_slice %1 {offsets = [0, 48], sizes = [5, 8], strides = [1, 1]} : vector<5x96xbf16> to vector<5x8xbf16>
    %43 = vector.extract_strided_slice %1 {offsets = [0, 80], sizes = [5, 8], strides = [1, 1]} : vector<5x96xbf16> to vector<5x8xbf16>
    %cst_12 = arith.constant dense<0.000000e+00> : vector<5x5xf32>
    %44 = tpu.matmul %41, %42, %cst_12 {dimension_numbers = #tpu.dot_dimension_numbers<[1], [1], [0], [0], [0, 0, 1, 0], [], []>} : vector<5x8xbf16>, vector<5x8xbf16>, vector<5x5xf32> -> vector<5x5xf32>
    %cst_13 = arith.constant 0.353553385 : f32
    %45 = vector.broadcast %cst_13 : f32 to vector<5x5xf32>
    %46 = arith.mulf %44, %45 : vector<5x5xf32>
    %cst_14 = arith.constant dense<0xFF800000> : vector<5xf32>
    %47 = vector.multi_reduction <maximumf>, %46, %cst_14 [1] : vector<5x5xf32> to vector<5xf32>
    %48 = vector.shape_cast %47 : vector<5xf32> to vector<5x1xf32>
    %49 = vector.broadcast %48 : vector<5x1xf32> to vector<5x5xf32>
    %50 = arith.subf %46, %49 : vector<5x5xf32>
    %51 = math.exp %50 : vector<5x5xf32>
    %cst_15 = arith.constant dense<0.000000e+00> : vector<5xf32>
    %52 = vector.multi_reduction <add>, %51, %cst_15 [1] : vector<5x5xf32> to vector<5xf32>
    %53 = vector.shape_cast %52 : vector<5xf32> to vector<5x1xf32>
    %54 = tpu.reciprocal %53 {approx = true} : vector<5x1xf32> -> vector<5x1xf32>
    %55 = vector.broadcast %54 : vector<5x1xf32> to vector<5x5xf32>
    %56 = arith.mulf %51, %55 : vector<5x5xf32>
    %57 = arith.addf %38, %56 : vector<5x5xf32>
    %58 = arith.truncf %56 : vector<5x5xf32> to vector<5x5xbf16>
    %cst_16 = arith.constant dense<0.000000e+00> : vector<5x8xf32>
    %59 = tpu.matmul %58, %43, %cst_16 {dimension_numbers = #tpu.dot_dimension_numbers<[1], [0], [0], [1], [0, 0, 1, 1], [], []>} : vector<5x5xbf16>, vector<5x8xbf16>, vector<5x8xf32> -> vector<5x8xf32>
    %60 = vector.extract_strided_slice %1 {offsets = [0, 24], sizes = [5, 8], strides = [1, 1]} : vector<5x96xbf16> to vector<5x8xbf16>
    %61 = vector.extract_strided_slice %1 {offsets = [0, 56], sizes = [5, 8], strides = [1, 1]} : vector<5x96xbf16> to vector<5x8xbf16>
    %62 = vector.extract_strided_slice %1 {offsets = [0, 88], sizes = [5, 8], strides = [1, 1]} : vector<5x96xbf16> to vector<5x8xbf16>
    %cst_17 = arith.constant dense<0.000000e+00> : vector<5x5xf32>
    %63 = tpu.matmul %60, %61, %cst_17 {dimension_numbers = #tpu.dot_dimension_numbers<[1], [1], [0], [0], [0, 0, 1, 0], [], []>} : vector<5x8xbf16>, vector<5x8xbf16>, vector<5x5xf32> -> vector<5x5xf32>
    %cst_18 = arith.constant 0.353553385 : f32
    %64 = vector.broadcast %cst_18 : f32 to vector<5x5xf32>
    %65 = arith.mulf %63, %64 : vector<5x5xf32>
    %cst_19 = arith.constant dense<0xFF800000> : vector<5xf32>
    %66 = vector.multi_reduction <maximumf>, %65, %cst_19 [1] : vector<5x5xf32> to vector<5xf32>
    %67 = vector.shape_cast %66 : vector<5xf32> to vector<5x1xf32>
    %68 = vector.broadcast %67 : vector<5x1xf32> to vector<5x5xf32>
    %69 = arith.subf %65, %68 : vector<5x5xf32>
    %70 = math.exp %69 : vector<5x5xf32>
    %cst_20 = arith.constant dense<0.000000e+00> : vector<5xf32>
    %71 = vector.multi_reduction <add>, %70, %cst_20 [1] : vector<5x5xf32> to vector<5xf32>
    %72 = vector.shape_cast %71 : vector<5xf32> to vector<5x1xf32>
    %73 = tpu.reciprocal %72 {approx = true} : vector<5x1xf32> -> vector<5x1xf32>
    %74 = vector.broadcast %73 : vector<5x1xf32> to vector<5x5xf32>
    %75 = arith.mulf %70, %74 : vector<5x5xf32>
    %76 = arith.addf %57, %75 : vector<5x5xf32>
    %77 = arith.truncf %75 : vector<5x5xf32> to vector<5x5xbf16>
    %cst_21 = arith.constant dense<0.000000e+00> : vector<5x8xf32>
    %78 = tpu.matmul %77, %62, %cst_21 {dimension_numbers = #tpu.dot_dimension_numbers<[1], [0], [0], [1], [0, 0, 1, 1], [], []>} : vector<5x5xbf16>, vector<5x8xbf16>, vector<5x8xf32> -> vector<5x8xf32>
    %79 = tpu.concatenate %21, %40, %59, %78 in 1 : vector<5x8xf32>, vector<5x8xf32>, vector<5x8xf32>, vector<5x8xf32> -> vector<5x32xf32>
    %80 = arith.truncf %79 : vector<5x32xf32> to vector<5x32xbf16>
    %c0_22 = arith.constant 0 : index
    %c0_23 = arith.constant 0 : index
    %c0_24 = arith.constant 0 : index
    %81 = vector.load %arg2[%c0_22, %c0_23, %c0_24] : memref<1x5x32xbf16, #tpu.memory_space<vmem>>, vector<1x5x32xbf16>
    %82 = vector.shape_cast %81 : vector<1x5x32xbf16> to vector<5x32xbf16>
    %83 = vector.shape_cast %80 : vector<5x32xbf16> to vector<1x5x32xbf16>
    tpu.vector_store %arg2[%c0_22, %c0_23, %c0_24], %83 {strides = array<i32>} : memref<1x5x32xbf16, #tpu.memory_space<vmem>>, vector<1x5x32xbf16>,
    %cst_25 = arith.constant 2.500000e-01 : f32
    %84 = vector.broadcast %cst_25 : f32 to vector<5x5xf32>
    %85 = arith.mulf %76, %84 : vector<5x5xf32>
    %c0_26 = arith.constant 0 : index
    %c0_27 = arith.constant 0 : index
    %c0_28 = arith.constant 0 : index
    %86 = vector.load %arg3[%c0_26, %c0_27, %c0_28] : memref<1x5x5xf32, #tpu.memory_space<vmem>>, vector<1x5x5xf32>
    %87 = vector.shape_cast %86 : vector<1x5x5xf32> to vector<5x5xf32>
    %88 = vector.shape_cast %85 : vector<5x5xf32> to vector<1x5x5xf32>
    tpu.vector_store %arg3[%c0_26, %c0_27, %c0_28], %88 {strides = array<i32>} : memref<1x5x5xf32, #tpu.memory_space<vmem>>, vector<1x5x5xf32>,
    return
  }
  func.func @transform_0(%arg0: i32) -> (i32, i32, i32) {
    %c0_i32 = arith.constant 0 : i32
    %c0_i32_0 = arith.constant 0 : i32
    %c0_i32_1 = arith.constant 0 : i32
    return %arg0, %c0_i32, %c0_i32_0 : i32, i32, i32
  }
  func.func @transform_1(%arg0: i32) -> (i32, i32, i32) {
    %c0_i32 = arith.constant 0 : i32
    %c0_i32_0 = arith.constant 0 : i32
    %c0_i32_1 = arith.constant 0 : i32
    return %arg0, %c0_i32, %c0_i32_0 : i32, i32, i32
  }
  func.func @transform_2(%arg0: i32) -> (i32, i32, i32) {
    %c0_i32 = arith.constant 0 : i32
    %c0_i32_0 = arith.constant 0 : i32
    %c0_i32_1 = arith.constant 0 : i32
    return %arg0, %c0_i32, %c0_i32_0 : i32, i32, i32
  }
}

module attributes {stable_mosaic.version = 11 : i64} {
  func.func @_linear_residual_kernel(%arg0: i32, %arg1: memref<8x64xbf16, #tpu.memory_space<vmem>>, %arg2: memref<64x32xbf16, #tpu.memory_space<vmem>>, %arg3: memref<1x32xf32, #tpu.memory_space<vmem>>, %arg4: memref<8x32xbf16, #tpu.memory_space<vmem>>, %arg5: memref<8x32xbf16, #tpu.memory_space<vmem>>) attributes {dimension_semantics = [#tpu.dimension_semantics<parallel>], iteration_bounds = array<i64: 2>, scalar_prefetch = 0 : i64, scratch_operands = 0 : i64, tpu.core_type = #tpu.core_type<tc>, window_params = [{transform_indices = @transform_0, window_bounds = array<i64: 8, 64>}, {pipeline_mode = #tpu.pipeline_mode<synchronous>, transform_indices = @transform_1, window_bounds = array<i64: 64, 32>}, {pipeline_mode = #tpu.pipeline_mode<synchronous>, transform_indices = @transform_2, window_bounds = array<i64: 1, 32>}, {transform_indices = @transform_3, window_bounds = array<i64: 8, 32>}, {transform_indices = @transform_4, window_bounds = array<i64: 8, 32>}]} {
    %c0 = arith.constant 0 : index
    %c0_0 = arith.constant 0 : index
    %0 = vector.load %arg1[%c0, %c0_0] : memref<8x64xbf16, #tpu.memory_space<vmem>>, vector<8x64xbf16>
    %c0_1 = arith.constant 0 : index
    %c0_2 = arith.constant 0 : index
    %1 = vector.load %arg2[%c0_1, %c0_2] : memref<64x32xbf16, #tpu.memory_space<vmem>>, vector<64x32xbf16>
    %cst = arith.constant dense<0.000000e+00> : vector<8x32xf32>
    %2 = tpu.matmul %0, %1, %cst {dimension_numbers = #tpu.dot_dimension_numbers<[1], [0], [0], [1], [0, 0, 1, 1], [], []>} : vector<8x64xbf16>, vector<64x32xbf16>, vector<8x32xf32> -> vector<8x32xf32>
    %c0_3 = arith.constant 0 : index
    %c0_4 = arith.constant 0 : index
    %3 = vector.load %arg3[%c0_3, %c0_4] : memref<1x32xf32, #tpu.memory_space<vmem>>, vector<1x32xf32>
    %4 = vector.broadcast %3 : vector<1x32xf32> to vector<8x32xf32>
    %5 = arith.addf %2, %4 : vector<8x32xf32>
    %c0_5 = arith.constant 0 : index
    %c0_6 = arith.constant 0 : index
    %6 = vector.load %arg4[%c0_5, %c0_6] : memref<8x32xbf16, #tpu.memory_space<vmem>>, vector<8x32xbf16>
    %7 = arith.extf %6 : vector<8x32xbf16> to vector<8x32xf32>
    %8 = arith.addf %5, %7 : vector<8x32xf32>
    %9 = arith.truncf %8 : vector<8x32xf32> to vector<8x32xbf16>
    %c0_7 = arith.constant 0 : index
    %c0_8 = arith.constant 0 : index
    %10 = vector.load %arg5[%c0_7, %c0_8] : memref<8x32xbf16, #tpu.memory_space<vmem>>, vector<8x32xbf16>
    tpu.vector_store %arg5[%c0_7, %c0_8], %9 {strides = array<i32>} : memref<8x32xbf16, #tpu.memory_space<vmem>>, vector<8x32xbf16>,
    return
  }
  func.func @transform_0(%arg0: i32) -> (i32, i32) {
    %c0_i32 = arith.constant 0 : i32
    %c0_i32_0 = arith.constant 0 : i32
    return %arg0, %c0_i32 : i32, i32
  }
  func.func @transform_1(%arg0: i32) -> (i32, i32) {
    %c0_i32 = arith.constant 0 : i32
    %c0_i32_0 = arith.constant 0 : i32
    %c0_i32_1 = arith.constant 0 : i32
    return %c0_i32, %c0_i32_0 : i32, i32
  }
  func.func @transform_2(%arg0: i32) -> (i32, i32) {
    %c0_i32 = arith.constant 0 : i32
    %c0_i32_0 = arith.constant 0 : i32
    %c0_i32_1 = arith.constant 0 : i32
    return %c0_i32, %c0_i32_0 : i32, i32
  }
  func.func @transform_3(%arg0: i32) -> (i32, i32) {
    %c0_i32 = arith.constant 0 : i32
    %c0_i32_0 = arith.constant 0 : i32
    return %arg0, %c0_i32 : i32, i32
  }
  func.func @transform_4(%arg0: i32) -> (i32, i32) {
    %c0_i32 = arith.constant 0 : i32
    %c0_i32_0 = arith.constant 0 : i32
    return %arg0, %c0_i32 : i32, i32
  }
}

module attributes {stable_mosaic.version = 11 : i64} {
  func.func @_layernorm_kernel(%arg0: i32, %arg1: memref<8x32xbf16, #tpu.memory_space<vmem>>, %arg2: memref<1x32xf32, #tpu.memory_space<vmem>>, %arg3: memref<1x32xf32, #tpu.memory_space<vmem>>, %arg4: memref<8x32xf32, #tpu.memory_space<vmem>>) attributes {dimension_semantics = [#tpu.dimension_semantics<parallel>], iteration_bounds = array<i64: 2>, scalar_prefetch = 0 : i64, scratch_operands = 0 : i64, tpu.core_type = #tpu.core_type<tc>, window_params = [{transform_indices = @transform_0, window_bounds = array<i64: 8, 32>}, {pipeline_mode = #tpu.pipeline_mode<synchronous>, transform_indices = @transform_1, window_bounds = array<i64: 1, 32>}, {pipeline_mode = #tpu.pipeline_mode<synchronous>, transform_indices = @transform_2, window_bounds = array<i64: 1, 32>}, {transform_indices = @transform_3, window_bounds = array<i64: 8, 32>}]} {
    %c0 = arith.constant 0 : index
    %c0_0 = arith.constant 0 : index
    %0 = vector.load %arg1[%c0, %c0_0] : memref<8x32xbf16, #tpu.memory_space<vmem>>, vector<8x32xbf16>
    %1 = arith.extf %0 : vector<8x32xbf16> to vector<8x32xf32>
    %cst = arith.constant dense<0.000000e+00> : vector<8xf32>
    %2 = vector.multi_reduction <add>, %1, %cst [1] : vector<8x32xf32> to vector<8xf32>
    %3 = vector.shape_cast %2 : vector<8xf32> to vector<8x1xf32>
    %cst_1 = arith.constant 3.200000e+01 : f32
    %4 = vector.broadcast %cst_1 : f32 to vector<8x1xf32>
    %5 = arith.divf %3, %4 : vector<8x1xf32>
    %6 = vector.broadcast %5 : vector<8x1xf32> to vector<8x32xf32>
    %7 = arith.subf %1, %6 : vector<8x32xf32>
    %8 = vector.broadcast %5 : vector<8x1xf32> to vector<8x32xf32>
    %9 = arith.subf %1, %8 : vector<8x32xf32>
    %10 = arith.mulf %7, %9 : vector<8x32xf32>
    %cst_2 = arith.constant dense<0.000000e+00> : vector<8xf32>
    %11 = vector.multi_reduction <add>, %10, %cst_2 [1] : vector<8x32xf32> to vector<8xf32>
    %12 = vector.shape_cast %11 : vector<8xf32> to vector<8x1xf32>
    %cst_3 = arith.constant 3.200000e+01 : f32
    %13 = vector.broadcast %cst_3 : f32 to vector<8x1xf32>
    %14 = arith.divf %12, %13 : vector<8x1xf32>
    %15 = vector.broadcast %5 : vector<8x1xf32> to vector<8x32xf32>
    %16 = arith.subf %1, %15 : vector<8x32xf32>
    %cst_4 = arith.constant 9.99999997E-7 : f32
    %17 = vector.broadcast %cst_4 : f32 to vector<8x1xf32>
    %18 = arith.addf %14, %17 : vector<8x1xf32>
    %19 = math.rsqrt %18 : vector<8x1xf32>
    %20 = vector.broadcast %19 : vector<8x1xf32> to vector<8x32xf32>
    %21 = arith.mulf %16, %20 : vector<8x32xf32>
    %c0_5 = arith.constant 0 : index
    %c0_6 = arith.constant 0 : index
    %22 = vector.load %arg2[%c0_5, %c0_6] : memref<1x32xf32, #tpu.memory_space<vmem>>, vector<1x32xf32>
    %23 = vector.broadcast %22 : vector<1x32xf32> to vector<8x32xf32>
    %24 = arith.mulf %21, %23 : vector<8x32xf32>
    %c0_7 = arith.constant 0 : index
    %c0_8 = arith.constant 0 : index
    %25 = vector.load %arg3[%c0_7, %c0_8] : memref<1x32xf32, #tpu.memory_space<vmem>>, vector<1x32xf32>
    %26 = vector.broadcast %25 : vector<1x32xf32> to vector<8x32xf32>
    %27 = arith.addf %24, %26 : vector<8x32xf32>
    %c0_9 = arith.constant 0 : index
    %c0_10 = arith.constant 0 : index
    %28 = vector.load %arg4[%c0_9, %c0_10] : memref<8x32xf32, #tpu.memory_space<vmem>>, vector<8x32xf32>
    tpu.vector_store %arg4[%c0_9, %c0_10], %27 {strides = array<i32>} : memref<8x32xf32, #tpu.memory_space<vmem>>, vector<8x32xf32>,
    return
  }
  func.func @transform_0(%arg0: i32) -> (i32, i32) {
    %c0_i32 = arith.constant 0 : i32
    %c0_i32_0 = arith.constant 0 : i32
    return %arg0, %c0_i32 : i32, i32
  }
  func.func @transform_1(%arg0: i32) -> (i32, i32) {
    %c0_i32 = arith.constant 0 : i32
    %c0_i32_0 = arith.constant 0 : i32
    %c0_i32_1 = arith.constant 0 : i32
    return %c0_i32, %c0_i32_0 : i32, i32
  }
  func.func @transform_2(%arg0: i32) -> (i32, i32) {
    %c0_i32 = arith.constant 0 : i32
    %c0_i32_0 = arith.constant 0 : i32
    %c0_i32_1 = arith.constant 0 : i32
    return %c0_i32, %c0_i32_0 : i32, i32
  }
  func.func @transform_3(%arg0: i32) -> (i32, i32) {
    %c0_i32 = arith.constant 0 : i32
    %c0_i32_0 = arith.constant 0 : i32
    return %arg0, %c0_i32 : i32, i32
  }
}

</mosaic_0001>

<bundles_post_ra>
// kernel: vit_forward.12
= control target key start
LH: loop header
LB: loop body
LE: loop exit
PB: predicated region body
PF: predicated region fallthrough
CT: control target
= control target key end

     0   :  { %s887_s12 = smov 0   ;;  %s889_s13 = smov 0   ;;  %s970_s0 = inlined_call_operand.vmem [shape: bf16[8,3072], index: 0, kind: input, shape index: {}]   ;;  %s971_s1 = inlined_call_operand.vmem [shape: bf16[3072,32], index: 1, kind: input, shape index: {}]   ;;  %s972_s2 = inlined_call_operand.vmem [shape: f32[1,32], index: 2, kind: input, shape index: {}]   ;;  %s973_s3 = inlined_call_operand.vmem [shape: bf16[8,32], index: 3, kind: output, shape index: {}]  }
   0x1   :  { %s891_s14 = smov 0  }
   0x2 LB: > { %s22_s15 = sadd.s32 1, %s860_s13  ;;  %p646_p0 = scmp.ge.s32.totalorder %s864_s14, 1  ;;  %s864_s14 = sphi %s891_s14, %s13_s14   ;;  %s860_s13 = sphi %s889_s13, %s975_s13   ;;  %s856_s12 = sphi %s887_s12, %s974_s12  }
   0x3   : > { %p23_p1 = scmp.ge.s32.totalorder %s22_s15, 6  ;;  %p167_p2 = scmp.lt.s32.totalorder %s864_s14, 7 }
   0x5   : > { %s977_s15 = smov (%p23_p1, %s22_s15), 0  ;;  %p168_p3 = pnand %p646_p0, %p167_p2 }
   0x6   : > { %s647_s16 = sshll.u32 (!%p168_p3), %s856_s12, 2  ;;  %s649_s17 = sshll.u32 (!%p168_p3), %s856_s12, 6 }
   0x7   : > { %171 = sbr.rel (%p168_p3) target bundleno = 207 (0xcf), region = 32  ;;  %p202_p4 = scmp.lt.s32.totalorder (!%p168_p3), %s647_s16, 23 }
   0x8   : > { %p210_p5 = scmp.lt.s32.totalorder (!%p168_p3), %s649_s17, 383  ;;  %p651_p6 = scmp.ne.s32.totalorder (!%p168_p3), %s856_s12, 0 }
   0xc   : > { %s979_s16 = smov (!%p202_p4, %s647_s16), 23  ;;  %s981_s17 = smov (!%p210_p5, %s649_s17), 383 }
   0xd   : > { %s648_s18 = sshll.u32 %s979_s16, 2  ;;  %s650_s22 = sshll.u32 %s981_s17, 2 }
   0xe   : > { %s912_s21 = scalar_lea.vmem %s970_s0, %s648_s18  ;;  %s917_s25 = scalar_lea.vmem %s971_s1, %s650_s22 }
   0xf   : > { %222 = sbr.rel (%p651_p6) target bundleno = 22 (0x16), region = 36 }
  0x14   : > { %vm223_vm0 = vcmask 261120   ;;  %v866_v0 = vmov 0.0  }
  0x15   : > { %224 = vst.msk [vmem:[#allocation2] sm:$0xff] %vm223_vm0, %v866_v0 }
  0x16 PF: > { %v791_v1 = vld [vmem:[%s917_s25 + $0x38] sm:$0xff]  ;;  %v790_v5 = vld [vmem:[%s917_s25 + $0x30] sm:$0xff]  ;;  %v789_v9 = vld [vmem:[%s917_s25 + $0x28] sm:$0xff]  ;;  %vm551_vm1 = vcmask 261120   ;;  %p780_p7 = scmp.ne.s32.totalorder %s856_s12, 5 }
  0x17   : > { %v799_v2 = vld [vmem:[%s917_s25 + $0x78] sm:$0xff]  ;;  %498 = vmatpush.bf16.msra.mxu0 %v791_v1  ;;  %v798_v6 = vld [vmem:[%s917_s25 + $0x70] sm:$0xff]  ;;  %v797_v10 = vld [vmem:[%s917_s25 + $0x68] sm:$0xff] }
  0x18   : > { %v807_v3 = vld [vmem:[%s917_s25 + $0xb8] sm:$0xff]  ;;  %511 = vmatpush.bf16.msra.mxu1 %v799_v2  ;;  %v806_v7 = vld [vmem:[%s917_s25 + $0xb0] sm:$0xff]  ;;  %v805_v11 = vld [vmem:[%s917_s25 + $0xa8] sm:$0xff] }
  0x19   : > { %v815_v4 = vld [vmem:[%s917_s25 + $0xf8] sm:$0xff]  ;;  %524 = vmatpush.bf16.msra.mxu2 %v807_v3  ;;  %v814_v8 = vld [vmem:[%s917_s25 + $0xf0] sm:$0xff]  ;;  %v813_v12 = vld [vmem:[%s917_s25 + $0xe8] sm:$0xff] }
  0x1a   : > { %537 = vmatpush.bf16.msra.mxu3 %v815_v4  ;;  %v788_v13 = vld [vmem:[%s917_s25 + $0x20] sm:$0xff]  ;;  %v787_v17 = vld [vmem:[%s917_s25 + $0x18] sm:$0xff]  ;;  %v786_v21 = vld [vmem:[%s917_s25 + $0x10] sm:$0xff] }
  0x1b   : > { %499 = vmatpush.bf16.msra.mxu0 %v790_v5  ;;  %v796_v14 = vld [vmem:[%s917_s25 + $0x60] sm:$0xff]  ;;  %v795_v18 = vld [vmem:[%s917_s25 + $0x58] sm:$0xff]  ;;  %v794_v22 = vld [vmem:[%s917_s25 + $0x50] sm:$0xff] }
  0x1c   : > { %512 = vmatpush.bf16.msra.mxu1 %v798_v6  ;;  %v804_v15 = vld [vmem:[%s917_s25 + $0xa0] sm:$0xff]  ;;  %v803_v19 = vld [vmem:[%s917_s25 + $0x98] sm:$0xff]  ;;  %v802_v23 = vld [vmem:[%s917_s25 + $0x90] sm:$0xff] }
  0x1d   : > { %525 = vmatpush.bf16.msra.mxu2 %v806_v7  ;;  %v812_v16 = vld [vmem:[%s917_s25 + $0xe0] sm:$0xff]  ;;  %v811_v20 = vld [vmem:[%s917_s25 + $0xd8] sm:$0xff]  ;;  %v810_v24 = vld [vmem:[%s917_s25 + $0xd0] sm:$0xff] }
  0x1e   : > { %538 = vmatpush.bf16.msra.mxu3 %v814_v8  ;;  %v785_v25 = vld [vmem:[%s917_s25 + $0x8] sm:$0xff]  ;;  %v226_v27 = vld [vmem:[%s912_s21] sm:$0xff] }
  0x1f   : > { %500 = vmatpush.bf16.msra.mxu0 %v789_v9  ;;  %v793_v26 = vld [vmem:[%s917_s25 + $0x48] sm:$0xff]  ;;  %v294_v31 = vunpack.c.l.b16 %v226_v27  ;;  %v295_v32 = vunpack.c.h.b16 %v226_v27  ;;  %v784_v33 = vld [vmem:[%s917_s25] sm:$0xff] }
  0x20   : > { %513 = vmatpush.bf16.msra.mxu1 %v797_v10  ;;  %v801_v28 = vld [vmem:[%s917_s25 + $0x88] sm:$0xff]  ;;  %v792_v34 = vld [vmem:[%s917_s25 + $0x40] sm:$0xff] }
  0x21   : > { %526 = vmatpush.bf16.msra.mxu2 %v805_v11  ;;  %v809_v29 = vld [vmem:[%s917_s25 + $0xc8] sm:$0xff]  ;;  %v800_v37 = vld [vmem:[%s917_s25 + $0x80] sm:$0xff]  ;;  %v298_v39 = vpack.c.b16 %v294_v31, %v294_v31  ;;  %v299_v40 = vpack.c.b16 %v295_v32, %v295_v32 }
  0x22   : > { %539 = vmatpush.bf16.msra.mxu3 %v813_v12  ;;  %v227_v30 = vld [vmem:[%s912_s21 + $0x8] sm:$0xff]  ;;  %v808_v38 = vld [vmem:[%s917_s25 + $0xc0] sm:$0xff] }
  0x23   : > { %501 = vmatpush.bf16.msra.mxu0 %v788_v13  ;;  %v296_v35 = vunpack.c.l.b16 %v227_v30  ;;  %v297_v36 = vunpack.c.h.b16 %v227_v30  ;;  %v225_v51 = vld [vmem:[#allocation2] sm:$0xff] }
  0x24   : > { %514 = vmatpush.bf16.msra.mxu1 %v796_v14 }
  0x25   : > { %527 = vmatpush.bf16.msra.mxu2 %v804_v15  ;;  %v300_v41 = vpack.c.b16 %v296_v35, %v296_v35  ;;  %v301_v42 = vpack.c.b16 %v297_v36, %v297_v36 }
  0x26   : > { %540 = vmatpush.bf16.msra.mxu3 %v812_v16 }
  0x27   : > { %502 = vmatpush.bf16.msra.mxu0 %v787_v17 }
  0x28   : > { %515 = vmatpush.bf16.msra.mxu1 %v795_v18 }
  0x29   : > { %528 = vmatpush.bf16.msra.mxu2 %v803_v19 }
  0x2a   : > { %541 = vmatpush.bf16.msra.mxu3 %v811_v20 }
  0x2b   : > { %503 = vmatpush.bf16.msra.mxu0 %v786_v21 }
  0x2c   : > { %516 = vmatpush.bf16.msra.mxu1 %v794_v22 }
  0x2d   : > { %529 = vmatpush.bf16.msra.mxu2 %v802_v23 }
  0x2e   : > { %542 = vmatpush.bf16.msra.mxu3 %v810_v24 }
  0x2f   : > { %504 = vmatpush.bf16.msra.mxu0 %v785_v25 }
  0x30   : > { %517 = vmatpush.bf16.msra.mxu1 %v793_v26 }
  0x31   : > { %530 = vmatpush.bf16.msra.mxu2 %v801_v28 }
  0x32   : > { %543 = vmatpush.bf16.msra.mxu3 %v809_v29 }
  0x33   : > { %505 = vmatpush.bf16.msra.mxu0 %v784_v33 }
  0x34   : > { %518 = vmatpush.bf16.msra.mxu1 %v792_v34 }
  0x35   : > { %531 = vmatpush.bf16.msra.mxu2 %v800_v37 }
  0x36   : > { %544 = vmatpush.bf16.msra.mxu3 %v808_v38  ;;  %506 = vmatmul.bf16.vlgmr.msra.gmra.mxu0 %v298_v39 }
  0x37   : > { %519 = vmatmul.bf16.vlgmr.msra.gmra.mxu1 %v299_v40 }
  0x38   : > { %532 = vmatmul.bf16.vlgmr.msra.gmra.mxu2 %v300_v41 }
  0x39   : > { %545 = vmatmul.bf16.vlgmr.msra.gmra.mxu3 %v301_v42 }
  0xb3   : > { %v507_v43 = vpop.f32.mrf.mxu0 }
  0xb4   : > { %v520_v44 = vpop.f32.mrf.mxu1 }
  0xb5   : > { %v521_v45 = vadd.f32 %v520_v44, %v507_v43 }
  0xbb   : > { %v533_v46 = vpop.f32.mrf.mxu2  ;;  %v509_v49 = vpop.f32.mrf.mxu0 }
  0xbc   : > { %v546_v47 = vpop.f32.mrf.mxu3  ;;  %v534_v48 = vadd.f32 %v533_v46, %v521_v45  ;;  %v522_v50 = vpop.f32.mrf.mxu1 }
  0xbe   : > { %v547_v52 = vadd.f32 %v546_v47, %v534_v48 }
  0xc0   : > { %v550_v53 = vadd.f32 %v547_v52, %v225_v51  ;;  %556 = sbr.rel (%p780_p7) target bundleno = 207 (0xcf), region = 40 }
  0xc2   : > { %552 = vst.msk [vmem:[#allocation2] sm:$0xff] %vm551_vm1, %v550_v53 }
  0xc3   : > { %v535_v54 = vpop.f32.mrf.mxu2 }
  0xc4   : > { %v548_v55 = vpop.f32.mrf.mxu3 }
  0xc5   : > { %v841_v57 = vld [vmem:[%s972_s2] ss:$0 sm:$0xff]  ;;  %vm564_vm2 = vcmask 257024  }
  0xc9   : > { %v557_v56 = vld [vmem:[#allocation2] sm:$0xff] }
  0xca   : > { %v562_v58 = vadd.f32 %v841_v57, %v557_v56 }
  0xcc   : > { %v563_v59 = vpack.c.bf16 %v562_v58, %v562_v58 }
  0xce   : > { %565 = vst.msk [vmem:[%s973_s3] sm:$0xf] %vm564_vm2, %v563_v59 }
  0xcf PF: > { %s13_s14 = sadd.s32 1, %s864_s14   ;;  %s974_s12 = smov %s860_s13 }
  0xd0   : > { %p10_p8 = scmp.ge.s32.totalorder %s13_s14, 8   ;;  %s975_s13 = smov %s977_s15 }
  0xd2   :  { %12 = sbr.rel (!%p10_p8) target bundleno = 2 (0x2), region = 73 }

// kernel: vit_forward.13
= control target key start
LH: loop header
LB: loop body
LE: loop exit
PB: predicated region body
PF: predicated region fallthrough
CT: control target
= control target key end

     0   :  { %s431_s18 = smov 0   ;;  %s473_s0 = inlined_call_operand.vmem [shape: bf16[16,32], index: 0, kind: input, shape index: {}]   ;;  %s474_s1 = inlined_call_operand.vmem [shape: f32[1,32], index: 1, kind: input, shape index: {}]   ;;  %s475_s2 = inlined_call_operand.vmem [shape: f32[1,32], index: 2, kind: input, shape index: {}]   ;;  %s476_s3 = inlined_call_operand.vmem [shape: bf16[32,96], index: 3, kind: input, shape index: {}]   ;;  %s477_s4 = inlined_call_operand.vmem [shape: f32[1,96], index: 4, kind: input, shape index: {}]   ;;  %s478_s5 = inlined_call_operand.vmem [shape: bf16[16,96], index: 5, kind: output, shape index: {}]  }
   0x1 LB: > { %s356_s19 = sadd.s32 4294967295, %s398_s18   ;;  %p360_p0 = scmp.ge.s32.totalorder %s398_s18, 1  ;;  %s398_s18 = sphi %s431_s18, %s15_s18  }
   0x2   : > { %p186_p1 = scmp.lt.s32.totalorder %s398_s18, 3 }
   0x4   : > { %p187_p2 = pnand %p360_p0, %p186_p1 }
   0x5   : > { %p212_p3 = scmp.lt.s32.totalorder (!%p187_p2), %s356_s19, 1 }
   0x6   : > { %190 = sbr.rel (%p187_p2) target bundleno = 421 (0x1a5), region = 40 }
   0xb   : > { %s480_s19 = smov (!%p212_p3, %s356_s19), 1  ;;  %vm223_vm0 = vcmask 261120   ;;  %v400_v3 = vmov 32.0   ;;  %v375_v15 = vld [vmem:[%s476_s3 + $0x8] sm:$0xff]  ;;  %v374_v16 = vld [vmem:[%s476_s3] sm:$0xff]  ;;  %vm301_vm5 = vcmask 781312  }
   0xc   : > { %s361_s20 = sshll.u32 %s480_s19, 2  ;;  %388 = vrcp.f32 %v400_v3  ;;  %293 = vmatpush.bf16.msra.mxu0 %v375_v15  ;;  %v385_v26 = vld [vmem:[%s474_s1] ss:$0 sm:$0xff] }
   0xd   : > { %s215_s23 = scalar_lea.vmem %s473_s0, %s361_s20  ;;  %v386_v29 = vld [vmem:[%s475_s2] ss:$0 sm:$0xff]  ;;  %s219_s11 = scalar_lea.vmem %s478_s5, %s361_s20 }
   0xe   : > { %v221_v0 = vld [vmem:[%s215_s23] sm:$0xf] }
   0xf   : > { %v222_v1 = vunpack.c.l.bf16 %v221_v0  ;;  %v387_v33 = vld [vmem:[%s477_s4] ss:$0 sm:$0xff] }
  0x10   : > { %294 = vmatpush.bf16.msra.mxu0 %v374_v16 }
  0x11   : > { %v224_v2 = vsel %vm223_vm0, %v222_v1, 0.0 }
  0x12   : > { %225 = vadd.xlane.f32.xlu0 %v224_v2  ;;  %v389_v4 = vpop.eup %388 }
  0x13   : > { %v228_v5 = vmul.f32 32.0, %v389_v4  ;;  %vm232_vm1 = vweird.f32 %v389_v4 }
  0x15   : > { %v229_v6 = vsub.f32 1.0, %v228_v5 }
  0x17   : > { %v230_v7 = vmul.f32 %v389_v4, %v229_v6 }
  0x19   : > { %v231_v8 = vadd.f32 %v389_v4, %v230_v7 }
  0x1b   : > { %v233_v9 = vsel %vm232_vm1, %v389_v4, %v231_v8 }
  0x85   : > { %v226_v10 = vpop.xlane.xlu0 %225 }
  0x86   : > { %v234_v11 = vmul.f32 %v233_v9, %v226_v10 }
  0x88   : > { %v235_v12 = vsub.f32 %v222_v1, %v234_v11 }
  0x8a   : > { %v236_v13 = vmul.f32 %v235_v12, %v235_v12 }
  0x8c   : > { %v237_v14 = vsel %vm223_vm0, %v236_v13, 0.0 }
  0x8d   : > { %238 = vadd.xlane.f32.xlu0 %v237_v14 }
 0x100   : > { %v239_v17 = vpop.xlane.xlu0 %238 }
 0x101   : > { %v240_v18 = vmul.f32 %v239_v17, %v233_v9 }
 0x103   : > { %v241_v19 = vadd.f32 1e-06, %v240_v18 }
 0x105   : > { %390 = vrsqrt.f32 %v241_v19  ;;  %vm248_vm3 = vweird.f32 %v241_v19 }
 0x10b   : > { %v391_v20 = vpop.eup %390 }
 0x10c   : > { %v243_v21 = vmul.f32 %v391_v20, %v241_v19  ;;  %vm249_vm2 = vweird.f32 %v391_v20 }
 0x10d   : > { %vm250_vm4 = vmor %vm248_vm3, %vm249_vm2 }
 0x10e   : > { %v244_v22 = vmul.f32 %v391_v20, %v243_v21 }
 0x110   : > { %v245_v23 = vmul.f32 0.5, %v244_v22 }
 0x112   : > { %v246_v24 = vsub.f32 1.5, %v245_v23 }
 0x114   : > { %v247_v25 = vmul.f32 %v391_v20, %v246_v24 }
 0x116   : > { %v251_v27 = vsel %vm250_vm4, %v391_v20, %v247_v25 }
 0x117   : > { %v252_v28 = vmul.f32 %v251_v27, %v235_v12 }
 0x119   : > { %v257_v30 = vmul.f32 %v385_v26, %v252_v28 }
 0x11b   : > { %v262_v31 = vadd.f32 %v386_v29, %v257_v30 }
 0x11d   : > { %v263_v32 = vpack.c.bf16 %v262_v31, %v262_v31 }
 0x11f   : > { %371 = vmatmul.msk.bf16.vlgmr.msra.gmra.mxu0 %vm223_vm0, %v263_v32 }
 0x19c   : > { %v296_v34 = vpop.f32.mrf.mxu0 }
 0x19d   : > { %v297_v35 = vadd.f32 %v387_v33, %v296_v34 }
 0x19f   : > { %v300_v36 = vpack.c.bf16 %v297_v35, %v297_v35 }
 0x1a1   : > { %302 = vst.msk [vmem:[%s219_s11] sm:$0xf] %vm301_vm5, %v300_v36 }
 0x1a4   : > { %v298_v37 = vpop.f32.mrf.mxu0 }
 0x1a5 PF: > { %s15_s18 = sadd.s32 1, %s398_s18  }
 0x1a6   : > { %p12_p4 = scmp.ge.s32.totalorder %s15_s18, 4  }
 0x1a8   :  { %14 = sbr.rel (!%p12_p4) target bundleno = 1 (0x1), region = 70 }

// kernel: vit_forward.14
= control target key start
LH: loop header
LB: loop body
LE: loop exit
PB: predicated region body
PF: predicated region fallthrough
CT: control target
= control target key end

     0   :  { %s516_s6 = smov 0   ;;  %s583_s0 = inlined_call_operand.vmem [shape: bf16[2,5,96], index: 0, kind: input, shape index: {}]   ;;  %s584_s1 = inlined_call_operand.vmem [shape: bf16[2,5,32], index: 1, kind: output, shape index: {}]  }
   0x1 LB: > { %s427_s7 = sadd.s32 4294967295, %s489_s6   ;;  %p431_p0 = scmp.ge.s32.totalorder %s489_s6, 1  ;;  %s489_s6 = sphi %s516_s6, %s11_s6  }
   0x2   : > { %p86_p1 = scmp.lt.s32.totalorder %s489_s6, 3 }
   0x4   : > { %p87_p2 = pnand %p431_p0, %p86_p1 }
   0x5   : > { %p104_p3 = scmp.lt.s32.totalorder (!%p87_p2), %s427_s7, 1  ;;  %s491_s12 = smov (!%p87_p2), 96  }
   0x6   : > { %90 = sbr.rel (%p87_p2) target bundleno = 1199 (0x4af), region = 24  ;;  %s492_s13 = smov (!%p87_p2), 88  }
   0x7   : > { %s493_s14 = smov (!%p87_p2), 120   ;;  %s494_s15 = smov (!%p87_p2), 64  }
   0x8   : > { %s495_s16 = smov (!%p87_p2), 80   ;;  %s496_s17 = smov (!%p87_p2), 72  }
   0x9   : > { %s497_s18 = smov (!%p87_p2), 112   ;;  %s498_s19 = smov (!%p87_p2), 104  }
   0xa   : > { %s500_s20 = smov (!%p87_p2), 56   ;;  %s501_s21 = smov (!%p87_p2), 40  }
   0xb   : > { %s586_s7 = smov (!%p104_p3, %s427_s7), 1  ;;  %vm119_vm0 = vcmask 64512   ;;  %vm140_vm1 = vcmask 36864   ;;  %vm159_vm2 = vcmask 1041408   ;;  %vm160_vm3 = vcmask 1042432   ;;  %s502_s22 = smov 48  }
   0xc   : > { %s432_s8 = sshll.u32 %s586_s7, 2  ;;  %v499_v16 = vmov 65535   ;;  %vm155_vm4 = vcmask 39936   ;;  %s503_s23 = smov 8   ;;  %vm363_vm5 = vcmask 130048   ;;  %vm365_vm6 = vcmask 195584  }
   0xd   : > { %s107_s11 = scalar_lea.vmem %s583_s0, %s432_s8  ;;  %v161_v17 = vsel %vm159_vm2, 4294967295, %v499_v16  ;;  %s504_s24 = smov 16   ;;  %vm368_vm7 = vcmask 256000   ;;  %vm369_vm8 = vsmask.f32 2304 }
   0xe   : > { %v113_v0 = vld [vmem:[%s107_s11] sm:$0x7]  ;;  %v548_v18 = vsel %vm160_vm3, %v161_v17, 0  ;;  %s505_s25 = smov 24   ;;  %s111_s28 = scalar_lea.vmem %s584_s1, %s432_s8  ;;  %vm370_vm9 = vmand %vm368_vm7, %vm369_vm8 }
   0xf   : > { %v115_v1 = vunpack.c.l.b16 %v113_v0 }
  0x11   : > { %v532_v2 = vpack.c.b16 %v115_v1, %v115_v1 }
  0x13   : > { %117 = vrot.lane.b32.xlu0 %v532_v2, %s491_s12  ;;  %181 = vrot.lane.b32.xlu1 %v532_v2, %s492_s13 }
  0x14   : > { %179 = vrot.lane.b32.xlu2 %v532_v2, %s493_s14 }
  0x1c   : > { %153 = vrot.lane.b32.xlu2 %v532_v2, %s494_s15 }
  0x24   : > { %238 = vrot.lane.b32.xlu2 %v532_v2, %s495_s16 }
  0x2c   : > { %295 = vrot.lane.b32.xlu2 %v532_v2, %s496_s17 }
  0x34   : > { %236 = vrot.lane.b32.xlu2 %v532_v2, %s497_s18 }
  0x3c   : > { %293 = vrot.lane.b32.xlu2 %v532_v2, %s498_s19 }
  0x6e   : > { %v180_v7 = vpop.permute.xlu2 %179 }
  0x76   : > { %v154_v12 = vpop.permute.xlu2 %153 }
  0x77   : > { %v164_v19 = vand.u32 %v548_v18, %v154_v12 }
  0x79   : > { %173 = vmatpush.bf16.msra.mxu1 %v164_v19 }
  0x7e   : > { %v239_v13 = vpop.permute.xlu2 %238 }
  0x7f   : > { %v244_v20 = vsel %vm119_vm0, %v239_v13, 0 }
  0x80   : > { %253 = vmatpush.bf16.xpose.msrb.mxu1 %v244_v20 }
  0x85   : > { %v118_v3 = vpop.permute.xlu0 %117  ;;  %v182_v5 = vpop.permute.xlu1 %181 }
  0x86   : > { %v124_v4 = vsel %vm119_vm0, %v118_v3, 0  ;;  %v187_v6 = vsel %vm119_vm0, %v182_v5, 0  ;;  %v296_v14 = vpop.permute.xlu2 %295 }
  0x87   : > { %133 = vmatpush.bf16.xpose.msra.mxu0 %v124_v4  ;;  %196 = vmatpush.bf16.xpose.msra.mxu2 %v187_v6  ;;  %v301_v15 = vsel %vm119_vm0, %v296_v14, 0 }
  0x8e   : > { %434 = vmatmul.msk.bf16.vlgmr.msra.gmra.mxu0 %vm119_vm0, %v113_v0  ;;  %436 = vmatmul.msk.bf16.vlgmr.msra.gmra.mxu2 %vm119_vm0, %v180_v7  ;;  %v237_v21 = vpop.permute.xlu2 %236 }
  0x8f   : > { %310 = vmatpush.bf16.xpose.msrb.mxu0 %v301_v15 }
  0x96   : > { %v294_v22 = vpop.permute.xlu2 %293 }
  0x9e   : > { %440 = vmatmul.msk.bf16.vlgmr.msrb.gmra.mxu0 %vm119_vm0, %v294_v22 }
 0x10b   : > { %v135_v8 = vpop.f32.mrf.mxu0 }
 0x10c   : > { %v139_v9 = vmul.f32 0.35355338, %v135_v8 }
 0x10e   : > { %v141_v10 = vsel %vm140_vm1, %v139_v9, -inf }
 0x10f   : > { %142 = vmax.xlane.f32.xlu0 %v141_v10 }
 0x111   : > { %v198_v23 = vpop.f32.mrf.mxu2 }
 0x112   : > { %v202_v24 = vmul.f32 0.35355338, %v198_v23 }
 0x113   : > { %v137_v11 = vpop.f32.mrf.mxu0 }
 0x114   : > { %v203_v26 = vsel %vm140_vm1, %v202_v24, -inf }
 0x115   : > { %204 = vmax.xlane.f32.xlu2 %v203_v26  ;;  %v371_v26 = vld [vmem:[%s111_s28] sm:$0x7] }
 0x119   : > { %v200_v29 = vpop.f32.mrf.mxu2 }
 0x11b   : > { %v312_v32 = vpop.f32.mrf.mxu0 }
 0x11c   : > { %v316_v33 = vmul.f32 0.35355338, %v312_v32 }
 0x11e   : > { %v317_v34 = vsel %vm140_vm1, %v316_v33, -inf }
 0x123   : > { %v314_v36 = vpop.f32.mrf.mxu0 }
 0x182   : > { %v143_v25 = vpop.xlane.xlu0 %142 }
 0x183   : > { %v144_v27 = vsub.f32 %v139_v9, %v143_v25 }
 0x185   : > { %v145_v28 = vmul.f32 1.442695, %v144_v27 }
 0x187   : > { %467 = vpow2.f32 %v145_v28 }
 0x188   : > { %v205_v41 = vpop.xlane.xlu2 %204 }
 0x189   : > { %v206_v43 = vsub.f32 %v202_v24, %v205_v41 }
 0x18b   : > { %v207_v44 = vmul.f32 1.442695, %v206_v43 }
 0x18d   : > { %v468_v30 = vpop.eup %467 }
 0x18e   : > { %v147_v31 = vsel %vm140_vm1, %v468_v30, 0.0 }
 0x18f   : > { %148 = vadd.xlane.f32.xlu1 %v147_v31 }
 0x197   : > { %318 = vmax.xlane.f32.xlu1 %v317_v34 }
 0x1b0   : > { %215 = vrot.lane.b32.xlu1 %v532_v2, %s500_s20 }
 0x1b8   : > { %329 = vrot.lane.b32.xlu1 %v532_v2, %s501_s21 }
 0x202   : > { %v149_v35 = vpop.xlane.xlu1 %148 }
 0x203   : > { %469 = vrcp.f32 %v149_v35 }
 0x204   : > { %471 = vpow2.f32 %v207_v44 }
 0x209   : > { %v470_v37 = vpop.eup %469 }
 0x20a   : > { %v151_v38 = vmul.f32 %v470_v37, %v468_v30  ;;  %v319_v45 = vpop.xlane.xlu1 %318  ;;  %v472_v51 = vpop.eup %471 }
 0x20b   : > { %v320_v48 = vsub.f32 %v316_v33, %v319_v45  ;;  %v209_v53 = vsel %vm140_vm1, %v472_v51, 0.0 }
 0x20c   : > { %v152_v39 = vpack.c.bf16 %v151_v38, %v151_v38 }
 0x20d   : > { %v321_v50 = vmul.f32 1.442695, %v320_v48 }
 0x20e   : > { %435 = vmatmul.msk.bf16.vlgmr.msra.gmra.mxu1 %vm155_vm4, %v152_v39 }
 0x20f   : > { %473 = vpow2.f32 %v321_v50 }
 0x215   : > { %v474_v54 = vpop.eup %473 }
 0x216   : > { %v323_v55 = vsel %vm140_vm1, %v474_v54, 0.0 }
 0x21e   : > { %438 = vmatmul.msk.bf16.vlgmr.msrb.gmra.mxu1 %vm119_vm0, %v237_v21 }
 0x222   : > { %v216_v56 = vpop.permute.xlu1 %215 }
 0x223   : > { %v221_v57 = vand.u32 %v216_v56, %v548_v18 }
 0x225   : > { %230 = vmatpush.bf16.msra.mxu3 %v221_v57 }
 0x22a   : > { %v330_v58 = vpop.permute.xlu1 %329 }
 0x22b   : > { %v335_v59 = vand.u32 %v330_v58, %v548_v18 }
 0x22d   : > { %344 = vmatpush.bf16.msrb.mxu2 %v335_v59 }
 0x28b   : > { %v560_v40 = vpop.f32.mrf.mxu1 }
 0x293   : > { %v177_v42 = vpop.f32.mrf.mxu1 }
 0x29b   : > { %v255_v46 = vpop.f32.mrf.mxu1 }
 0x29c   : > { %v259_v47 = vmul.f32 0.35355338, %v255_v46 }
 0x29e   : > { %v260_v49 = vsel %vm140_vm1, %v259_v47, -inf }
 0x29f   : > { %261 = vmax.xlane.f32.xlu0 %v260_v49 }
 0x2a3   : > { %v257_v52 = vpop.f32.mrf.mxu1 }
 0x2a7   : > { %210 = vadd.xlane.f32.xlu0 %v209_v53 }
 0x2af   : > { %324 = vadd.xlane.f32.xlu0 %v323_v55 }
 0x312   : > { %v262_v60 = vpop.xlane.xlu0 %261 }
 0x313   : > { %v263_v61 = vsub.f32 %v259_v47, %v262_v60 }
 0x315   : > { %v264_v62 = vmul.f32 1.442695, %v263_v61 }
 0x317   : > { %475 = vpow2.f32 %v264_v62 }
 0x31a   : > { %v211_v63 = vpop.xlane.xlu0 %210 }
 0x31b   : > { %477 = vrcp.f32 %v211_v63 }
 0x31d   : > { %v476_v0 = vpop.eup %475 }
 0x31e   : > { %v266_v1 = vsel %vm140_vm1, %v476_v0, 0.0 }
 0x31f   : > { %267 = vadd.xlane.f32.xlu0 %v266_v1 }
 0x321   : > { %v478_v3 = vpop.eup %477 }
 0x322   : > { %v325_v4 = vpop.xlane.xlu0 %324  ;;  %v213_v5 = vmul.f32 %v478_v3, %v472_v51 }
 0x323   : > { %479 = vrcp.f32 %v325_v4 }
 0x324   : > { %v214_v6 = vpack.c.bf16 %v213_v5, %v213_v5 }
 0x326   : > { %437 = vmatmul.msk.bf16.vlgmr.msra.gmra.mxu3 %vm155_vm4, %v214_v6 }
 0x329   : > { %v480_v7 = vpop.eup %479 }
 0x32a   : > { %v327_v8 = vmul.f32 %v480_v7, %v474_v54 }
 0x32c   : > { %v328_v9 = vpack.c.bf16 %v327_v8, %v327_v8 }
 0x32e   : > { %441 = vmatmul.msk.bf16.vlgmr.msrb.gmra.mxu2 %vm155_vm4, %v328_v9 }
 0x333   : > { %272 = vrot.lane.b32.xlu0 %v532_v2, %s502_s22 }
 0x392   : > { %v268_v10 = vpop.xlane.xlu0 %267 }
 0x393   : > { %481 = vrcp.f32 %v268_v10 }
 0x399   : > { %v482_v11 = vpop.eup %481 }
 0x39a   : > { %v270_v12 = vmul.f32 %v482_v11, %v476_v0 }
 0x39c   : > { %v271_v16 = vpack.c.bf16 %v270_v12, %v270_v12 }
 0x3a5   : > { %v273_v13 = vpop.permute.xlu0 %272 }
 0x3a6   : > { %v278_v14 = vand.u32 %v273_v13, %v548_v18 }
 0x3a8   : > { %287 = vmatpush.bf16.msrb.mxu3 %v278_v14 }
 0x3a9   : > { %v232_v15 = vpop.f32.mrf.mxu3 }
 0x3aa   : > { %351 = vrot.lane.b32.xlu2 %v232_v15, %s503_s23 }
 0x3ab   : > { %439 = vmatmul.msk.bf16.vlgmr.msrb.gmra.mxu3 %vm155_vm4, %v271_v16 }
 0x3b1   : > { %v234_v17 = vpop.f32.mrf.mxu3  ;;  %v346_v19 = vpop.f32.mrf.mxu2 }
 0x3b9   : > { %v348_v20 = vpop.f32.mrf.mxu2 }
 0x404   : > { %v352_v23 = vpop.permute.xlu2 %351 }
 0x405   : > { %v362_v18 = vsel %vm119_vm0, %v560_v40, %v352_v23 }
 0x42e   : > { %v289_v21 = vpop.f32.mrf.mxu3 }
 0x42f   : > { %355 = vrot.lane.b32.xlu1 %v289_v21, %s504_s24 }
 0x436   : > { %v291_v2 = vpop.f32.mrf.mxu3 }
 0x437   : > { %359 = vrot.lane.b32.xlu1 %v346_v19, %s505_s25 }
 0x4a1   : > { %v356_v22 = vpop.permute.xlu1 %355 }
 0x4a2   : > { %v364_v24 = vsel %vm363_vm5, %v362_v18, %v356_v22 }
 0x4a9   : > { %v360_v25 = vpop.permute.xlu1 %359 }
 0x4aa   : > { %v366_v27 = vsel %vm365_vm6, %v364_v24, %v360_v25 }
 0x4ab   : > { %v367_v28 = vpack.c.bf16 %v366_v27, %v366_v27 }
 0x4ad   : > { %v372_v29 = vsel %vm370_vm9, %v367_v28, %v371_v26 }
 0x4ae   : > { %373 = vst [vmem:[%s111_s28] sm:$0x7] %v372_v29 }
 0x4af PF: > { %s11_s6 = sadd.s32 1, %s489_s6  }
 0x4b0   : > { %p8_p4 = scmp.ge.s32.totalorder %s11_s6, 4  }
 0x4b2   :  { %10 = sbr.rel (!%p8_p4) target bundleno = 1 (0x1), region = 54 }

// kernel: vit_forward.15
= control target key start
LH: loop header
LB: loop body
LE: loop exit
PB: predicated region body
PF: predicated region fallthrough
CT: control target
= control target key end

     0   :  { %s383_s15 = smov 0   ;;  %s412_s0 = inlined_call_operand.vmem [shape: bf16[16,32], index: 0, kind: input, shape index: {}]   ;;  %s413_s1 = inlined_call_operand.vmem [shape: bf16[32,32], index: 1, kind: input, shape index: {}]   ;;  %s414_s2 = inlined_call_operand.vmem [shape: f32[1,32], index: 2, kind: input, shape index: {}]   ;;  %s415_s3 = inlined_call_operand.vmem [shape: bf16[16,32], index: 3, kind: input, shape index: {}]   ;;  %s416_s4 = inlined_call_operand.vmem [shape: bf16[16,32], index: 4, kind: output, shape index: {}]  }
   0x1 LB: > { %s320_s16 = sadd.s32 4294967295, %s356_s15   ;;  %p324_p0 = scmp.ge.s32.totalorder %s356_s15, 1  ;;  %s356_s15 = sphi %s383_s15, %s14_s15  }
   0x2   : > { %p170_p1 = scmp.lt.s32.totalorder %s356_s15, 3 }
   0x4   : > { %p171_p2 = pnand %p324_p0, %p170_p1 }
   0x5   : > { %p198_p3 = scmp.lt.s32.totalorder (!%p171_p2), %s320_s16, 1 }
   0x6   : > { %174 = sbr.rel (%p171_p2) target bundleno = 153 (0x99), region = 36 }
   0xb   : > { %v340_v0 = vld [vmem:[%s413_s1 + $0x8] sm:$0xff]  ;;  %v339_v1 = vld [vmem:[%s413_s1] sm:$0xff]  ;;  %s418_s16 = smov (!%p198_p3, %s320_s16), 1  ;;  %vm232_vm0 = vcmask 261120   ;;  %vm253_vm1 = vcmask 257024  }
   0xc   : > { %242 = vmatpush.bf16.msra.mxu0 %v340_v0  ;;  %s325_s21 = sshll.u32 %s418_s16, 2  ;;  %v349_v4 = vld [vmem:[%s414_s2] ss:$0 sm:$0xff] }
   0xd   : > { %s201_s24 = scalar_lea.vmem %s412_s0, %s325_s21  ;;  %s205_s27 = scalar_lea.vmem %s415_s3, %s325_s21 }
   0xe   : > { %v211_v2 = vld [vmem:[%s201_s24] sm:$0xf]  ;;  %s209_s6 = scalar_lea.vmem %s416_s4, %s325_s21 }
   0xf   : > { %v249_v3 = vld [vmem:[%s205_s27] sm:$0xf] }
  0x10   : > { %243 = vmatpush.bf16.msra.mxu0 %v339_v1  ;;  %v250_v5 = vunpack.c.l.bf16 %v249_v3 }
  0x13   : > { %336 = vmatmul.msk.bf16.vlgmr.msra.gmra.mxu0 %vm232_vm0, %v211_v2 }
  0x90   : > { %v245_v6 = vpop.f32.mrf.mxu0 }
  0x91   : > { %v246_v7 = vadd.f32 %v349_v4, %v245_v6 }
  0x93   : > { %v251_v8 = vadd.f32 %v250_v5, %v246_v7 }
  0x95   : > { %v252_v9 = vpack.c.bf16 %v251_v8, %v251_v8 }
  0x97   : > { %254 = vst.msk [vmem:[%s209_s6] sm:$0xf] %vm253_vm1, %v252_v9 }
  0x98   : > { %v247_v10 = vpop.f32.mrf.mxu0 }
  0x99 PF: > { %s14_s15 = sadd.s32 1, %s356_s15  }
  0x9a   : > { %p11_p4 = scmp.ge.s32.totalorder %s14_s15, 4  }
  0x9c   :  { %13 = sbr.rel (!%p11_p4) target bundleno = 1 (0x1), region = 69 }

// kernel: vit_forward.16
= control target key start
LH: loop header
LB: loop body
LE: loop exit
PB: predicated region body
PF: predicated region fallthrough
CT: control target
= control target key end

     0   :  { %s478_s18 = smov 0   ;;  %s520_s0 = inlined_call_operand.vmem [shape: bf16[16,32], index: 0, kind: input, shape index: {}]   ;;  %s521_s1 = inlined_call_operand.vmem [shape: f32[1,32], index: 1, kind: input, shape index: {}]   ;;  %s522_s2 = inlined_call_operand.vmem [shape: f32[1,32], index: 2, kind: input, shape index: {}]   ;;  %s523_s3 = inlined_call_operand.vmem [shape: bf16[32,64], index: 3, kind: input, shape index: {}]   ;;  %s524_s4 = inlined_call_operand.vmem [shape: f32[1,64], index: 4, kind: input, shape index: {}]   ;;  %s525_s5 = inlined_call_operand.vmem [shape: bf16[16,64], index: 5, kind: output, shape index: {}]  }
   0x1 LB: > { %s400_s19 = sadd.s32 4294967295, %s445_s18   ;;  %p404_p0 = scmp.ge.s32.totalorder %s445_s18, 1  ;;  %s445_s18 = sphi %s478_s18, %s15_s18  }
   0x2   : > { %p186_p1 = scmp.lt.s32.totalorder %s445_s18, 3 }
   0x4   : > { %p187_p2 = pnand %p404_p0, %p186_p1 }
   0x5   : > { %p212_p3 = scmp.lt.s32.totalorder (!%p187_p2), %s400_s19, 1 }
   0x6   : > { %190 = sbr.rel (%p187_p2) target bundleno = 469 (0x1d5), region = 40 }
   0xb   : > { %s527_s19 = smov (!%p212_p3, %s400_s19), 1  ;;  %vm223_vm0 = vcmask 261120   ;;  %v447_v3 = vmov 32.0   ;;  %v420_v15 = vld [vmem:[%s523_s3 + $0x8] sm:$0xff]  ;;  %v419_v16 = vld [vmem:[%s523_s3] sm:$0xff]  ;;  %vm345_vm9 = vcmask 519168  }
   0xc   : > { %s405_s20 = sshll.u32 %s527_s19, 2  ;;  %433 = vrcp.f32 %v447_v3  ;;  %293 = vmatpush.bf16.msra.mxu0 %v420_v15  ;;  %v430_v26 = vld [vmem:[%s521_s1] ss:$0 sm:$0xff] }
   0xd   : > { %s215_s23 = scalar_lea.vmem %s520_s0, %s405_s20  ;;  %v431_v29 = vld [vmem:[%s522_s2] ss:$0 sm:$0xff]  ;;  %s219_s11 = scalar_lea.vmem %s525_s5, %s405_s20 }
   0xe   : > { %v221_v0 = vld [vmem:[%s215_s23] sm:$0xf] }
   0xf   : > { %v222_v1 = vunpack.c.l.bf16 %v221_v0  ;;  %v432_v33 = vld [vmem:[%s524_s4] ss:$0 sm:$0xff] }
  0x10   : > { %294 = vmatpush.bf16.msra.mxu0 %v419_v16 }
  0x11   : > { %v224_v2 = vsel %vm223_vm0, %v222_v1, 0.0 }
  0x12   : > { %225 = vadd.xlane.f32.xlu0 %v224_v2  ;;  %v434_v4 = vpop.eup %433 }
  0x13   : > { %v228_v5 = vmul.f32 32.0, %v434_v4  ;;  %vm232_vm1 = vweird.f32 %v434_v4 }
  0x15   : > { %v229_v6 = vsub.f32 1.0, %v228_v5 }
  0x17   : > { %v230_v7 = vmul.f32 %v434_v4, %v229_v6 }
  0x19   : > { %v231_v8 = vadd.f32 %v434_v4, %v230_v7 }
  0x1b   : > { %v233_v9 = vsel %vm232_vm1, %v434_v4, %v231_v8 }
  0x85   : > { %v226_v10 = vpop.xlane.xlu0 %225 }
  0x86   : > { %v234_v11 = vmul.f32 %v233_v9, %v226_v10 }
  0x88   : > { %v235_v12 = vsub.f32 %v222_v1, %v234_v11 }
  0x8a   : > { %v236_v13 = vmul.f32 %v235_v12, %v235_v12 }
  0x8c   : > { %v237_v14 = vsel %vm223_vm0, %v236_v13, 0.0 }
  0x8d   : > { %238 = vadd.xlane.f32.xlu0 %v237_v14 }
 0x100   : > { %v239_v17 = vpop.xlane.xlu0 %238 }
 0x101   : > { %v240_v18 = vmul.f32 %v239_v17, %v233_v9 }
 0x103   : > { %v241_v19 = vadd.f32 1e-06, %v240_v18 }
 0x105   : > { %435 = vrsqrt.f32 %v241_v19  ;;  %vm248_vm3 = vweird.f32 %v241_v19 }
 0x10b   : > { %v436_v20 = vpop.eup %435 }
 0x10c   : > { %v243_v21 = vmul.f32 %v436_v20, %v241_v19  ;;  %vm249_vm2 = vweird.f32 %v436_v20 }
 0x10d   : > { %vm250_vm4 = vmor %vm248_vm3, %vm249_vm2 }
 0x10e   : > { %v244_v22 = vmul.f32 %v436_v20, %v243_v21 }
 0x110   : > { %v245_v23 = vmul.f32 0.5, %v244_v22 }
 0x112   : > { %v246_v24 = vsub.f32 1.5, %v245_v23 }
 0x114   : > { %v247_v25 = vmul.f32 %v436_v20, %v246_v24 }
 0x116   : > { %v251_v27 = vsel %vm250_vm4, %v436_v20, %v247_v25 }
 0x117   : > { %v252_v28 = vmul.f32 %v251_v27, %v235_v12 }
 0x119   : > { %v257_v30 = vmul.f32 %v430_v26, %v252_v28 }
 0x11b   : > { %v262_v31 = vadd.f32 %v431_v29, %v257_v30 }
 0x11d   : > { %v263_v32 = vpack.c.bf16 %v262_v31, %v262_v31 }
 0x11f   : > { %415 = vmatmul.msk.bf16.vlgmr.msra.gmra.mxu0 %vm223_vm0, %v263_v32 }
 0x19c   : > { %v296_v34 = vpop.f32.mrf.mxu0 }
 0x19d   : > { %v297_v35 = vadd.f32 %v432_v33, %v296_v34 }
 0x19f   : > { %v301_v36 = vmul.f32 0.70710677, %v297_v35  ;;  %v300_v9 = vmul.f32 0.5, %v297_v35 }
 0x1a1   : > { %v302_v37 = vmul.f32 %v301_v36, %v301_v36 }
 0x1a3   : > { %v303_v38 = vmin.f32 %v302_v37, 16.0 }
 0x1a4   : > { %v298_v39 = vpop.f32.mrf.mxu0 }
 0x1a5   : > { %v304_v40 = vmul.f32 2.1237322e-06, %v303_v38  ;;  %v315_v41 = vmul.f32 3.8918573e-05, %v303_v38 }
 0x1a7   : > { %v305_v42 = vadd.f32 0.00028619796, %v304_v40  ;;  %v316_v43 = vadd.f32 0.001143296, %v315_v41 }
 0x1a9   : > { %v306_v44 = vmul.f32 %v305_v42, %v303_v38  ;;  %v317_v45 = vmul.f32 %v316_v43, %v303_v38 }
 0x1ab   : > { %v318_v46 = vadd.f32 0.014752088, %v317_v45  ;;  %v307_v47 = vadd.f32 0.0036580483, %v306_v44 }
 0x1ad   : > { %v319_v48 = vmul.f32 %v318_v46, %v303_v38  ;;  %v308_v50 = vmul.f32 %v307_v47, %v303_v38 }
 0x1af   : > { %v320_v49 = vadd.f32 0.112945676, %v319_v48  ;;  %v309_v53 = vadd.f32 0.05243302, %v308_v50 }
 0x1b1   : > { %v321_v51 = vmul.f32 %v320_v49, %v303_v38  ;;  %v310_v56 = vmul.f32 %v309_v53, %v303_v38 }
 0x1b3   : > { %v322_v52 = vadd.f32 0.4994258, %v321_v51  ;;  %v311_v57 = vadd.f32 0.18741608, %v310_v56 }
 0x1b5   : > { %v323_v54 = vmul.f32 %v322_v52, %v303_v38  ;;  %v312_v59 = vmul.f32 %v311_v57, %v303_v38 }
 0x1b7   : > { %v324_v55 = vadd.f32 1.0, %v323_v54  ;;  %v313_v63 = vadd.f32 1.1283791, %v312_v59 }
 0x1b9   : > { %437 = vrcp.f32 %v324_v55  ;;  %v336_v62 = vand.u32 2147483648, %v324_v55  ;;  %v334_v1 = vand.u32 2147483647, %v324_v55  ;;  %vm330_vm6 = vweird.f32 %v324_v55 }
 0x1ba   : > { %v314_v4 = vmul.f32 %v313_v63, %v301_v36 }
 0x1bb   : > { %v337_v3 = vor.u32 1.1754944e-38, %v336_v62  ;;  %vm335_vm8 = vcmp.eq.f32.partialorder %v334_v1, 8.507059e+37 }
 0x1bf   : > { %v438_v58 = vpop.eup %437 }
 0x1c0   : > { %v326_v60 = vmul.f32 %v438_v58, %v324_v55  ;;  %vm331_vm5 = vweird.f32 %v438_v58 }
 0x1c1   : > { %vm332_vm7 = vmor %vm330_vm6, %vm331_vm5 }
 0x1c2   : > { %v327_v61 = vsub.f32 1.0, %v326_v60 }
 0x1c4   : > { %v328_v0 = vmul.f32 %v438_v58, %v327_v61 }
 0x1c6   : > { %v329_v2 = vadd.f32 %v438_v58, %v328_v0 }
 0x1c8   : > { %v333_v5 = vsel %vm332_vm7, %v438_v58, %v329_v2 }
 0x1c9   : > { %v338_v6 = vsel %vm335_vm8, %v337_v3, %v333_v5 }
 0x1ca   : > { %v339_v7 = vmul.f32 %v338_v6, %v314_v4 }
 0x1cc   : > { %v416_v8 = vclamps-f32 %v339_v7, 1.0 }
 0x1ce   : > { %v342_v10 = vadd.f32 1.0, %v416_v8 }
 0x1d0   : > { %v343_v11 = vmul.f32 %v342_v10, %v300_v9 }
 0x1d2   : > { %v344_v12 = vpack.c.bf16 %v343_v11, %v343_v11 }
 0x1d4   : > { %346 = vst.msk [vmem:[%s219_s11] sm:$0xf] %vm345_vm9, %v344_v12 }
 0x1d5 PF: > { %s15_s18 = sadd.s32 1, %s445_s18  }
 0x1d6   : > { %p12_p4 = scmp.ge.s32.totalorder %s15_s18, 4  }
 0x1d8   :  { %14 = sbr.rel (!%p12_p4) target bundleno = 1 (0x1), region = 70 }

// kernel: vit_forward.17
= control target key start
LH: loop header
LB: loop body
LE: loop exit
PB: predicated region body
PF: predicated region fallthrough
CT: control target
= control target key end

     0   :  { %s409_s15 = smov 0   ;;  %s444_s0 = inlined_call_operand.vmem [shape: bf16[16,64], index: 0, kind: input, shape index: {}]   ;;  %s445_s1 = inlined_call_operand.vmem [shape: bf16[64,32], index: 1, kind: input, shape index: {}]   ;;  %s446_s2 = inlined_call_operand.vmem [shape: f32[1,32], index: 2, kind: input, shape index: {}]   ;;  %s447_s3 = inlined_call_operand.vmem [shape: bf16[16,32], index: 3, kind: input, shape index: {}]   ;;  %s448_s4 = inlined_call_operand.vmem [shape: bf16[16,32], index: 4, kind: output, shape index: {}]  }
   0x1 LB: > { %s336_s16 = sadd.s32 4294967295, %s382_s15   ;;  %p340_p0 = scmp.ge.s32.totalorder %s382_s15, 1  ;;  %s382_s15 = sphi %s409_s15, %s14_s15  }
   0x2   : > { %p170_p1 = scmp.lt.s32.totalorder %s382_s15, 3 }
   0x4   : > { %p171_p2 = pnand %p340_p0, %p170_p1 }
   0x5   : > { %p198_p3 = scmp.lt.s32.totalorder (!%p171_p2), %s336_s16, 1 }
   0x6   : > { %174 = sbr.rel (%p171_p2) target bundleno = 161 (0xa1), region = 36 }
   0xb   : > { %v366_v0 = vld [vmem:[%s445_s1 + $0x18] sm:$0xff]  ;;  %v365_v1 = vld [vmem:[%s445_s1 + $0x10] sm:$0xff]  ;;  %s450_s16 = smov (!%p198_p3, %s336_s16), 1  ;;  %v364_v2 = vld [vmem:[%s445_s1 + $0x8] sm:$0xff]  ;;  %vm248_vm0 = vcmask 523264   ;;  %vm269_vm1 = vcmask 257024  }
   0xc   : > { %256 = vmatpush.bf16.msra.mxu0 %v366_v0  ;;  %s341_s23 = sshll.u32 %s450_s16, 2  ;;  %v363_v3 = vld [vmem:[%s445_s1] sm:$0xff] }
   0xd   : > { %s201_s28 = scalar_lea.vmem %s444_s0, %s341_s23  ;;  %s205_s5 = scalar_lea.vmem %s447_s3, %s341_s23  ;;  %v375_v6 = vld [vmem:[%s446_s2] ss:$0 sm:$0xff] }
   0xe   : > { %v211_v4 = vld [vmem:[%s201_s28] sm:$0xf]  ;;  %s209_s10 = scalar_lea.vmem %s448_s4, %s341_s23 }
   0xf   : > { %v265_v5 = vld [vmem:[%s205_s5] sm:$0xf] }
  0x10   : > { %257 = vmatpush.bf16.msra.mxu0 %v365_v1  ;;  %v266_v7 = vunpack.c.l.bf16 %v265_v5 }
  0x14   : > { %258 = vmatpush.bf16.msra.mxu0 %v364_v2 }
  0x18   : > { %259 = vmatpush.bf16.msra.mxu0 %v363_v3 }
  0x1b   : > { %360 = vmatmul.msk.bf16.vlgmr.msra.gmra.mxu0 %vm248_vm0, %v211_v4 }
  0x98   : > { %v261_v8 = vpop.f32.mrf.mxu0 }
  0x99   : > { %v262_v9 = vadd.f32 %v375_v6, %v261_v8 }
  0x9b   : > { %v267_v10 = vadd.f32 %v266_v7, %v262_v9 }
  0x9d   : > { %v268_v11 = vpack.c.bf16 %v267_v10, %v267_v10 }
  0x9f   : > { %270 = vst.msk [vmem:[%s209_s10] sm:$0xf] %vm269_vm1, %v268_v11 }
  0xa0   : > { %v263_v12 = vpop.f32.mrf.mxu0 }
  0xa1 PF: > { %s14_s15 = sadd.s32 1, %s382_s15  }
  0xa2   : > { %p11_p4 = scmp.ge.s32.totalorder %s14_s15, 4  }
  0xa4   :  { %13 = sbr.rel (!%p11_p4) target bundleno = 1 (0x1), region = 69 }

// kernel: vit_forward.19
= control target key start
LH: loop header
LB: loop body
LE: loop exit
PB: predicated region body
PF: predicated region fallthrough
CT: control target
= control target key end

     0   :  { %s597_s9 = smov 0   ;;  %s669_s0 = inlined_call_operand.vmem [shape: bf16[2,5,96], index: 0, kind: input, shape index: {}]   ;;  %s670_s1 = inlined_call_operand.vmem [shape: bf16[2,5,32], index: 1, kind: output, shape index: {0}]   ;;  %s671_s2 = inlined_call_operand.vmem [shape: f32[2,5,5], index: 2, kind: output, shape index: {1}]  }
   0x1 LB: > { %s502_s10 = sadd.s32 4294967295, %s565_s9   ;;  %p506_p0 = scmp.ge.s32.totalorder %s565_s9, 1  ;;  %s565_s9 = sphi %s597_s9, %s13_s9  }
   0x2   : > { %p114_p1 = scmp.lt.s32.totalorder %s565_s9, 3 }
   0x4   : > { %p115_p2 = pnand %p506_p0, %p114_p1 }
   0x5   : > { %p138_p3 = scmp.lt.s32.totalorder (!%p115_p2), %s502_s10, 1  ;;  %s567_s15 = smov (!%p115_p2), 96  }
   0x6   : > { %118 = sbr.rel (%p115_p2) target bundleno = 1199 (0x4af), region = 24  ;;  %s568_s16 = smov (!%p115_p2), 88  }
   0x7   : > { %s569_s17 = smov (!%p115_p2), 120   ;;  %s570_s18 = smov (!%p115_p2), 64  }
   0x8   : > { %s571_s19 = smov (!%p115_p2), 80   ;;  %s572_s20 = smov (!%p115_p2), 72  }
   0x9   : > { %s573_s21 = smov (!%p115_p2), 112   ;;  %s574_s22 = smov (!%p115_p2), 104  }
   0xa   : > { %s576_s23 = smov (!%p115_p2), 56   ;;  %s577_s24 = smov (!%p115_p2), 40  }
   0xb   : > { %s673_s10 = smov (!%p138_p3, %s502_s10), 1  ;;  %vm157_vm0 = vcmask 64512   ;;  %vm178_vm1 = vcmask 36864   ;;  %vm198_vm2 = vcmask 1041408   ;;  %vm199_vm3 = vcmask 1042432   ;;  %s578_s25 = smov 48  }
   0xc   : > { %s507_s11 = sshll.u32 %s673_s10, 2  ;;  %v575_v16 = vmov 65535   ;;  %vm194_vm4 = vcmask 39936   ;;  %s509_s26 = sshll.u32 %s673_s10, 3  ;;  %vm405_vm5 = vcmask 130048   ;;  %vm407_vm6 = vcmask 195584  }
   0xd   : > { %s141_s14 = scalar_lea.vmem %s669_s0, %s507_s11  ;;  %v200_v17 = vsel %vm198_vm2, 4294967295, %v575_v16  ;;  %s149_s29 = scalar_lea.vmem %s671_s2, %s509_s26  ;;  %vm410_vm7 = vcmask 256000   ;;  %vm411_vm8 = vsmask.f32 2304 }
   0xe   : > { %v151_v0 = vld [vmem:[%s141_s14] sm:$0x7]  ;;  %v629_v18 = vsel %vm199_vm3, %v200_v17, 0  ;;  %s579_s30 = smov 8   ;;  %s580_s3 = smov 16   ;;  %vm412_vm9 = vmand %vm410_vm7, %vm411_vm8 }
   0xf   : > { %v153_v1 = vunpack.c.l.b16 %v151_v0  ;;  %s581_s4 = smov 24   ;;  %s145_s7 = scalar_lea.vmem %s670_s1, %s507_s11 }
  0x11   : > { %v613_v2 = vpack.c.b16 %v153_v1, %v153_v1 }
  0x13   : > { %155 = vrot.lane.b32.xlu0 %v613_v2, %s567_s15  ;;  %220 = vrot.lane.b32.xlu1 %v613_v2, %s568_s16 }
  0x14   : > { %218 = vrot.lane.b32.xlu2 %v613_v2, %s569_s17 }
  0x1c   : > { %192 = vrot.lane.b32.xlu2 %v613_v2, %s570_s18 }
  0x24   : > { %278 = vrot.lane.b32.xlu2 %v613_v2, %s571_s19 }
  0x2c   : > { %336 = vrot.lane.b32.xlu2 %v613_v2, %s572_s20 }
  0x34   : > { %276 = vrot.lane.b32.xlu2 %v613_v2, %s573_s21 }
  0x3c   : > { %334 = vrot.lane.b32.xlu2 %v613_v2, %s574_s22 }
  0x6e   : > { %v219_v7 = vpop.permute.xlu2 %218 }
  0x76   : > { %v193_v12 = vpop.permute.xlu2 %192 }
  0x77   : > { %v203_v19 = vand.u32 %v629_v18, %v193_v12 }
  0x79   : > { %212 = vmatpush.bf16.msra.mxu1 %v203_v19 }
  0x7e   : > { %v279_v13 = vpop.permute.xlu2 %278 }
  0x7f   : > { %v284_v20 = vsel %vm157_vm0, %v279_v13, 0 }
  0x80   : > { %293 = vmatpush.bf16.xpose.msrb.mxu1 %v284_v20 }
  0x85   : > { %v156_v3 = vpop.permute.xlu0 %155  ;;  %v221_v5 = vpop.permute.xlu1 %220 }
  0x86   : > { %v162_v4 = vsel %vm157_vm0, %v156_v3, 0  ;;  %v226_v6 = vsel %vm157_vm0, %v221_v5, 0  ;;  %v337_v14 = vpop.permute.xlu2 %336 }
  0x87   : > { %171 = vmatpush.bf16.xpose.msra.mxu0 %v162_v4  ;;  %235 = vmatpush.bf16.xpose.msra.mxu2 %v226_v6  ;;  %v342_v15 = vsel %vm157_vm0, %v337_v14, 0 }
  0x8e   : > { %510 = vmatmul.msk.bf16.vlgmr.msra.gmra.mxu0 %vm157_vm0, %v151_v0  ;;  %512 = vmatmul.msk.bf16.vlgmr.msra.gmra.mxu2 %vm157_vm0, %v219_v7  ;;  %v277_v21 = vpop.permute.xlu2 %276 }
  0x8f   : > { %351 = vmatpush.bf16.xpose.msrb.mxu0 %v342_v15 }
  0x96   : > { %v335_v22 = vpop.permute.xlu2 %334 }
  0x9e   : > { %516 = vmatmul.msk.bf16.vlgmr.msrb.gmra.mxu0 %vm157_vm0, %v335_v22 }
 0x10b   : > { %v173_v8 = vpop.f32.mrf.mxu0 }
 0x10c   : > { %v177_v9 = vmul.f32 0.35355338, %v173_v8 }
 0x10e   : > { %v179_v10 = vsel %vm178_vm1, %v177_v9, -inf }
 0x10f   : > { %180 = vmax.xlane.f32.xlu0 %v179_v10 }
 0x111   : > { %v237_v23 = vpop.f32.mrf.mxu2 }
 0x112   : > { %v241_v24 = vmul.f32 0.35355338, %v237_v23 }
 0x113   : > { %v175_v11 = vpop.f32.mrf.mxu0 }
 0x114   : > { %v242_v26 = vsel %vm178_vm1, %v241_v24, -inf }
 0x115   : > { %243 = vmax.xlane.f32.xlu2 %v242_v26 }
 0x119   : > { %v239_v29 = vpop.f32.mrf.mxu2 }
 0x11b   : > { %v353_v32 = vpop.f32.mrf.mxu0 }
 0x11c   : > { %v357_v33 = vmul.f32 0.35355338, %v353_v32 }
 0x11e   : > { %v358_v34 = vsel %vm178_vm1, %v357_v33, -inf }
 0x123   : > { %v355_v36 = vpop.f32.mrf.mxu0 }
 0x182   : > { %v181_v25 = vpop.xlane.xlu0 %180 }
 0x183   : > { %v182_v27 = vsub.f32 %v177_v9, %v181_v25 }
 0x185   : > { %v183_v28 = vmul.f32 1.442695, %v182_v27 }
 0x187   : > { %543 = vpow2.f32 %v183_v28 }
 0x188   : > { %v244_v41 = vpop.xlane.xlu2 %243 }
 0x189   : > { %v245_v43 = vsub.f32 %v241_v24, %v244_v41 }
 0x18b   : > { %v246_v44 = vmul.f32 1.442695, %v245_v43 }
 0x18d   : > { %v544_v30 = vpop.eup %543 }
 0x18e   : > { %v185_v31 = vsel %vm178_vm1, %v544_v30, 0.0 }
 0x18f   : > { %186 = vadd.xlane.f32.xlu1 %v185_v31 }
 0x197   : > { %359 = vmax.xlane.f32.xlu1 %v358_v34 }
 0x1b0   : > { %255 = vrot.lane.b32.xlu1 %v613_v2, %s576_s23 }
 0x1b8   : > { %371 = vrot.lane.b32.xlu1 %v613_v2, %s577_s24 }
 0x202   : > { %v187_v35 = vpop.xlane.xlu1 %186 }
 0x203   : > { %545 = vrcp.f32 %v187_v35 }
 0x204   : > { %547 = vpow2.f32 %v246_v44 }
 0x209   : > { %v546_v37 = vpop.eup %545 }
 0x20a   : > { %v189_v38 = vmul.f32 %v546_v37, %v544_v30  ;;  %v360_v45 = vpop.xlane.xlu1 %359  ;;  %v548_v51 = vpop.eup %547  ;;  %v413_v30 = vld [vmem:[%s145_s7] sm:$0x7] }
 0x20b   : > { %v361_v48 = vsub.f32 %v357_v33, %v360_v45  ;;  %v248_v53 = vsel %vm178_vm1, %v548_v51, 0.0 }
 0x20c   : > { %v191_v39 = vpack.c.bf16 %v189_v38, %v189_v38 }
 0x20d   : > { %v362_v50 = vmul.f32 1.442695, %v361_v48 }
 0x20e   : > { %511 = vmatmul.msk.bf16.vlgmr.msra.gmra.mxu1 %vm194_vm4, %v191_v39 }
 0x20f   : > { %549 = vpow2.f32 %v362_v50 }
 0x215   : > { %v550_v54 = vpop.eup %549 }
 0x216   : > { %v364_v55 = vsel %vm178_vm1, %v550_v54, 0.0 }
 0x21e   : > { %514 = vmatmul.msk.bf16.vlgmr.msrb.gmra.mxu1 %vm157_vm0, %v277_v21 }
 0x222   : > { %v256_v56 = vpop.permute.xlu1 %255 }
 0x223   : > { %v261_v57 = vand.u32 %v256_v56, %v629_v18 }
 0x225   : > { %270 = vmatpush.bf16.msra.mxu3 %v261_v57 }
 0x22a   : > { %v372_v58 = vpop.permute.xlu1 %371 }
 0x22b   : > { %v377_v59 = vand.u32 %v372_v58, %v629_v18 }
 0x22d   : > { %386 = vmatpush.bf16.msrb.mxu2 %v377_v59 }
 0x28b   : > { %v641_v40 = vpop.f32.mrf.mxu1 }
 0x293   : > { %v216_v42 = vpop.f32.mrf.mxu1 }
 0x29b   : > { %v295_v46 = vpop.f32.mrf.mxu1 }
 0x29c   : > { %v299_v47 = vmul.f32 0.35355338, %v295_v46 }
 0x29e   : > { %v300_v49 = vsel %vm178_vm1, %v299_v47, -inf }
 0x29f   : > { %301 = vmax.xlane.f32.xlu0 %v300_v49 }
 0x2a3   : > { %v297_v52 = vpop.f32.mrf.mxu1 }
 0x2a7   : > { %249 = vadd.xlane.f32.xlu0 %v248_v53 }
 0x2af   : > { %365 = vadd.xlane.f32.xlu0 %v364_v55 }
 0x312   : > { %v302_v60 = vpop.xlane.xlu0 %301 }
 0x313   : > { %v303_v61 = vsub.f32 %v299_v47, %v302_v60 }
 0x315   : > { %v304_v62 = vmul.f32 1.442695, %v303_v61 }
 0x317   : > { %551 = vpow2.f32 %v304_v62 }
 0x31a   : > { %v250_v63 = vpop.xlane.xlu0 %249 }
 0x31b   : > { %553 = vrcp.f32 %v250_v63 }
 0x31d   : > { %v552_v0 = vpop.eup %551 }
 0x31e   : > { %v306_v1 = vsel %vm178_vm1, %v552_v0, 0.0 }
 0x31f   : > { %307 = vadd.xlane.f32.xlu0 %v306_v1 }
 0x321   : > { %v554_v3 = vpop.eup %553 }
 0x322   : > { %v366_v4 = vpop.xlane.xlu0 %365  ;;  %v252_v5 = vmul.f32 %v554_v3, %v548_v51 }
 0x323   : > { %555 = vrcp.f32 %v366_v4 }
 0x324   : > { %v254_v6 = vpack.c.bf16 %v252_v5, %v252_v5  ;;  %v253_v12 = vadd.f32 %v252_v5, %v189_v38 }
 0x326   : > { %513 = vmatmul.msk.bf16.vlgmr.msra.gmra.mxu3 %vm194_vm4, %v254_v6 }
 0x329   : > { %v556_v7 = vpop.eup %555 }
 0x32a   : > { %v368_v8 = vmul.f32 %v556_v7, %v550_v54 }
 0x32c   : > { %v370_v9 = vpack.c.bf16 %v368_v8, %v368_v8 }
 0x32e   : > { %517 = vmatmul.msk.bf16.vlgmr.msrb.gmra.mxu2 %vm194_vm4, %v370_v9 }
 0x333   : > { %313 = vrot.lane.b32.xlu0 %v613_v2, %s578_s25 }
 0x392   : > { %v308_v10 = vpop.xlane.xlu0 %307 }
 0x393   : > { %557 = vrcp.f32 %v308_v10 }
 0x399   : > { %v558_v11 = vpop.eup %557 }
 0x39a   : > { %v310_v13 = vmul.f32 %v558_v11, %v552_v0 }
 0x39c   : > { %v311_v14 = vadd.f32 %v310_v13, %v253_v12  ;;  %v312_v20 = vpack.c.bf16 %v310_v13, %v310_v13 }
 0x39e   : > { %v369_v15 = vadd.f32 %v368_v8, %v311_v14 }
 0x3a0   : > { %v416_v16 = vmul.f32 0.25, %v369_v15 }
 0x3a2   : > { %417 = vst.msk [vmem:[%s149_s29] sm:$0x1f] %vm178_vm1, %v416_v16 }
 0x3a5   : > { %v314_v17 = vpop.permute.xlu0 %313 }
 0x3a6   : > { %v319_v19 = vand.u32 %v314_v17, %v629_v18 }
 0x3a8   : > { %328 = vmatpush.bf16.msrb.mxu3 %v319_v19 }
 0x3a9   : > { %v272_v2 = vpop.f32.mrf.mxu3 }
 0x3aa   : > { %393 = vrot.lane.b32.xlu2 %v272_v2, %s579_s30 }
 0x3ab   : > { %515 = vmatmul.msk.bf16.vlgmr.msrb.gmra.mxu3 %vm194_vm4, %v312_v20 }
 0x3b1   : > { %v274_v21 = vpop.f32.mrf.mxu3  ;;  %v388_v22 = vpop.f32.mrf.mxu2 }
 0x3b9   : > { %v390_v23 = vpop.f32.mrf.mxu2 }
 0x404   : > { %v394_v27 = vpop.permute.xlu2 %393 }
 0x405   : > { %v404_v18 = vsel %vm157_vm0, %v641_v40, %v394_v27 }
 0x42e   : > { %v330_v24 = vpop.f32.mrf.mxu3 }
 0x42f   : > { %397 = vrot.lane.b32.xlu1 %v330_v24, %s580_s3 }
 0x436   : > { %v332_v25 = vpop.f32.mrf.mxu3 }
 0x437   : > { %401 = vrot.lane.b32.xlu1 %v388_v22, %s581_s4 }
 0x4a1   : > { %v398_v26 = vpop.permute.xlu1 %397 }
 0x4a2   : > { %v406_v28 = vsel %vm405_vm5, %v404_v18, %v398_v26 }
 0x4a9   : > { %v402_v29 = vpop.permute.xlu1 %401 }
 0x4aa   : > { %v408_v31 = vsel %vm407_vm6, %v406_v28, %v402_v29 }
 0x4ab   : > { %v409_v32 = vpack.c.bf16 %v408_v31, %v408_v31 }
 0x4ad   : > { %v414_v33 = vsel %vm412_vm9, %v409_v32, %v413_v30 }
 0x4ae   : > { %415 = vst [vmem:[%s145_s7] sm:$0x7] %v414_v33 }
 0x4af PF: > { %s13_s9 = sadd.s32 1, %s565_s9  }
 0x4b0   : > { %p10_p4 = scmp.ge.s32.totalorder %s13_s9, 4  }
 0x4b2   :  { %12 = sbr.rel (!%p10_p4) target bundleno = 1 (0x1), region = 66 }

// kernel: vit_forward.23
= control target key start
LH: loop header
LB: loop body
LE: loop exit
PB: predicated region body
PF: predicated region fallthrough
CT: control target
= control target key end

     0   :  { %s315_s12 = smov 0   ;;  %s345_s0 = inlined_call_operand.vmem [shape: bf16[16,32], index: 0, kind: input, shape index: {}]   ;;  %s346_s1 = inlined_call_operand.vmem [shape: f32[1,32], index: 1, kind: input, shape index: {}]   ;;  %s347_s2 = inlined_call_operand.vmem [shape: f32[1,32], index: 2, kind: input, shape index: {}]   ;;  %s348_s3 = inlined_call_operand.vmem [shape: f32[16,32], index: 3, kind: output, shape index: {}]  }
   0x1 LB: > { %s262_s13 = sadd.s32 4294967295, %s292_s12   ;;  %p266_p0 = scmp.ge.s32.totalorder %s292_s12, 1  ;;  %s292_s12 = sphi %s315_s12, %s13_s12  }
   0x2   : > { %p136_p1 = scmp.lt.s32.totalorder %s292_s12, 3 }
   0x4   : > { %p137_p2 = pnand %p266_p0, %p136_p1 }
   0x5   : > { %p158_p3 = scmp.lt.s32.totalorder (!%p137_p2), %s262_s13, 1 }
   0x6   : > { %140 = sbr.rel (%p137_p2) target bundleno = 286 (0x11e), region = 32 }
   0xb   : > { %s350_s13 = smov (!%p158_p3, %s262_s13), 1  ;;  %vm168_vm0 = vcmask 261120   ;;  %v294_v3 = vmov 32.0   ;;  %v280_v24 = vld [vmem:[%s346_s1] ss:$0 sm:$0xff] }
   0xc   : > { %s267_s14 = sshll.u32 %s350_s13, 2  ;;  %282 = vrcp.f32 %v294_v3  ;;  %s268_s20 = sshll.u32 %s350_s13, 3  ;;  %v281_v26 = vld [vmem:[%s347_s2] ss:$0 sm:$0xff] }
   0xd   : > { %s161_s17 = scalar_lea.vmem %s345_s0, %s267_s14  ;;  %s165_s25 = scalar_lea.vmem %s348_s3, %s268_s20 }
   0xe   : > { %v166_v0 = vld [vmem:[%s161_s17] sm:$0xf] }
   0xf   : > { %v167_v1 = vunpack.c.l.bf16 %v166_v0 }
  0x11   : > { %v169_v2 = vsel %vm168_vm0, %v167_v1, 0.0 }
  0x12   : > { %170 = vadd.xlane.f32.xlu0 %v169_v2  ;;  %v283_v4 = vpop.eup %282 }
  0x13   : > { %v173_v5 = vmul.f32 32.0, %v283_v4  ;;  %vm177_vm1 = vweird.f32 %v283_v4 }
  0x15   : > { %v174_v6 = vsub.f32 1.0, %v173_v5 }
  0x17   : > { %v175_v7 = vmul.f32 %v283_v4, %v174_v6 }
  0x19   : > { %v176_v8 = vadd.f32 %v283_v4, %v175_v7 }
  0x1b   : > { %v178_v9 = vsel %vm177_vm1, %v283_v4, %v176_v8 }
  0x85   : > { %v171_v10 = vpop.xlane.xlu0 %170 }
  0x86   : > { %v179_v11 = vmul.f32 %v178_v9, %v171_v10 }
  0x88   : > { %v180_v12 = vsub.f32 %v167_v1, %v179_v11 }
  0x8a   : > { %v181_v13 = vmul.f32 %v180_v12, %v180_v12 }
  0x8c   : > { %v182_v14 = vsel %vm168_vm0, %v181_v13, 0.0 }
  0x8d   : > { %183 = vadd.xlane.f32.xlu0 %v182_v14 }
 0x100   : > { %v184_v15 = vpop.xlane.xlu0 %183 }
 0x101   : > { %v185_v16 = vmul.f32 %v184_v15, %v178_v9 }
 0x103   : > { %v186_v17 = vadd.f32 1e-06, %v185_v16 }
 0x105   : > { %284 = vrsqrt.f32 %v186_v17  ;;  %vm193_vm3 = vweird.f32 %v186_v17 }
 0x10b   : > { %v285_v18 = vpop.eup %284 }
 0x10c   : > { %v188_v19 = vmul.f32 %v285_v18, %v186_v17  ;;  %vm194_vm2 = vweird.f32 %v285_v18 }
 0x10d   : > { %vm195_vm4 = vmor %vm193_vm3, %vm194_vm2 }
 0x10e   : > { %v189_v20 = vmul.f32 %v285_v18, %v188_v19 }
 0x110   : > { %v190_v21 = vmul.f32 0.5, %v189_v20 }
 0x112   : > { %v191_v22 = vsub.f32 1.5, %v190_v21 }
 0x114   : > { %v192_v23 = vmul.f32 %v285_v18, %v191_v22 }
 0x116   : > { %v196_v25 = vsel %vm195_vm4, %v285_v18, %v192_v23 }
 0x117   : > { %v197_v27 = vmul.f32 %v196_v25, %v180_v12 }
 0x119   : > { %v202_v28 = vmul.f32 %v280_v24, %v197_v27 }
 0x11b   : > { %v207_v29 = vadd.f32 %v281_v26, %v202_v28 }
 0x11d   : > { %208 = vst.msk [vmem:[%s165_s25] sm:$0xff] %vm168_vm0, %v207_v29 }
 0x11e PF: > { %s13_s12 = sadd.s32 1, %s292_s12  }
 0x11f   : > { %p10_p4 = scmp.ge.s32.totalorder %s13_s12, 4  }
 0x121   :  { %12 = sbr.rel (!%p10_p4) target bundleno = 1 (0x1), region = 62 }

</bundles_post_ra>
